<compile_context>
chip_gen: v6e
topology: v6e:2x2x1
jax: 0.10.0
libtpu: 0.0.40
codegen_flags: <defaults>
</compile_context>

<pallas_src>
import jax
import jax.numpy as jnp
import numpy as np
from jax.experimental import pallas as pl
from jax.experimental.pallas import tpu as pltpu

HIDDEN = 100        # PyTorch hidden_size
IN_DIM = 300        # Linear in/out feature size
HP = 128            # padded hidden (lane-aligned)
IN_PAD = 384        # padded input width  (3 x 128)
OUT_PAD = 384       # padded output width (3 x 128)


def input_proj_kernel(x_ref, w_ref, b_ref, g_ref):
    """Time-batched input projection: g0x = X @ (W_inp @ W_ih0) + (b_inp @ W_ih0 + b0)."""
    g_ref[...] = (jnp.dot(x_ref[...], w_ref[...], preferred_element_type=jnp.float32)
                  + b_ref[...])


def rnn_seq_kernel(xzero_ref,                       # scalar-prefetch: (steps,) int32 in SMEM
                   g0x_ref, whh0_ref, wih1_ref, whh1_ref, b1_ref, wout_ref, bout_ref,
                   y_ref, h0_ref, c0_ref, h1_ref, c1_ref,
                   run_ref):
    """One grid step == one SimpleRNN.step (teacher-forced)."""
    t = pl.program_id(0)

    @pl.when(t == 0)
    def _init():                                    # hidden=None -> zeros; loop is live
        h0_ref[...] = jnp.zeros_like(h0_ref)
        c0_ref[...] = jnp.zeros_like(c0_ref)
        h1_ref[...] = jnp.zeros_like(h1_ref)
        c1_ref[...] = jnp.zeros_like(c1_ref)
        run_ref[0] = jnp.int32(1)

    @pl.when(run_ref[0] == 0)
    def _dead():
        # torch leaves the remaining rows of the zero-initialised `outputs` untouched.
        y_ref[...] = jnp.zeros_like(y_ref)

    @pl.when(run_ref[0] == 1)
    def _live():
        def gates_to_hc(g, c):
            # PyTorch gate order i, f, g, o; each gate is exactly one 128-lane block.
            i = jax.nn.sigmoid(g[:, 0 * HP:1 * HP])
            f = jax.nn.sigmoid(g[:, 1 * HP:2 * HP])
            gg = jnp.tanh(g[:, 2 * HP:3 * HP])
            o = jax.nn.sigmoid(g[:, 3 * HP:4 * HP])
            c_new = f * c + i * gg
            return o * jnp.tanh(c_new), c_new

        h0 = h0_ref[...]
        c0 = c0_ref[...]
        h1 = h1_ref[...]
        c1 = c1_ref[...]

        # LSTM layer 0 (input Linear folded + time-batched x-projection precomputed).
        g0 = g0x_ref[...] + jnp.dot(h0, whh0_ref[...],
                                    preferred_element_type=jnp.float32)
        h0n, c0n = gates_to_hc(g0, c0)

        # LSTM layer 1.
        # TODO(synk): nn.LSTM inter-layer dropout (p=0.05) is training-only; eval-mode identity.
        g1 = (jnp.dot(h0n, wih1_ref[...], preferred_element_type=jnp.float32)
              + jnp.dot(h1, whh1_ref[...], preferred_element_type=jnp.float32)
              + b1_ref[...])
        h1n, c1n = gates_to_hc(g1, c1)

        # out Linear
        y = jnp.dot(h1n, wout_ref[...],
                    preferred_element_type=jnp.float32) + bout_ref[...]    # (1, OUT_PAD)

        # torch stop test: sum(output[0]) == 0 or sum(inputs[i]) == 0
        # (padded lanes of y are exactly zero by construction).
        stop = jnp.logical_or(jnp.sum(y) == 0.0, xzero_ref[t] == 1)

        # The stopping step still updates hidden, but its output row is not stored.
        h0_ref[...] = h0n
        c0_ref[...] = c0n
        h1_ref[...] = h1n
        c1_ref[...] = c1n
        y_ref[...] = jnp.where(stop, jnp.zeros_like(y), y)
        run_ref[0] = jnp.where(stop, 0, 1).astype(jnp.int32)


def init_params(key):
    """Deterministic synthetic parameters, same shapes as the PyTorch module
    (stored transposed: (in_features, out_features); LSTM biases b_ih+b_hh pre-combined)."""
    ks = jax.random.split(key, 10)
    s = 0.1
    return {
        "w_inp": s * jax.random.normal(ks[0], (IN_DIM, HIDDEN), jnp.float32),
        "b_inp": s * jax.random.normal(ks[1], (1, HIDDEN), jnp.float32),
        "w_ih0": s * jax.random.normal(ks[2], (HIDDEN, 4 * HIDDEN), jnp.float32),
        "w_hh0": s * jax.random.normal(ks[3], (HIDDEN, 4 * HIDDEN), jnp.float32),
        "b0":    s * jax.random.normal(ks[4], (1, 4 * HIDDEN), jnp.float32),
        "w_ih1": s * jax.random.normal(ks[5], (HIDDEN, 4 * HIDDEN), jnp.float32),
        "w_hh1": s * jax.random.normal(ks[6], (HIDDEN, 4 * HIDDEN), jnp.float32),
        "b1":    s * jax.random.normal(ks[7], (1, 4 * HIDDEN), jnp.float32),
        "w_out": s * jax.random.normal(ks[8], (HIDDEN, IN_DIM), jnp.float32),
        "b_out": s * jax.random.normal(ks[9], (1, IN_DIM), jnp.float32),
    }


def prepare_fused_params(p):
    """Zero-pad to lane-aligned sizes and fold the input Linear into LSTM layer 0
    (done in float64 numpy for accuracy)."""
    q = {k: np.asarray(v, np.float64) for k, v in p.items()}

    def pad_to(a, shape):
        return np.pad(a, [(0, s - d) for d, s in zip(a.shape, shape)])

    def pad_gate_cols(a):   # (..., 4*HIDDEN) -> (..., 4*HP), each gate block padded separately
        parts = []
        for k in range(4):
            blk = a[..., k * HIDDEN:(k + 1) * HIDDEN]
            parts.append(np.pad(blk, [(0, 0)] * (a.ndim - 1) + [(0, HP - HIDDEN)]))
        return np.concatenate(parts, axis=-1)

    w_inp = pad_to(q["w_inp"], (IN_PAD, HP))
    b_inp = pad_to(q["b_inp"], (1, HP))
    w_ih0 = pad_to(pad_gate_cols(q["w_ih0"]), (HP, 4 * HP))
    w_hh0 = pad_to(pad_gate_cols(q["w_hh0"]), (HP, 4 * HP))
    b0 = pad_gate_cols(q["b0"])
    w_ih1 = pad_to(pad_gate_cols(q["w_ih1"]), (HP, 4 * HP))
    w_hh1 = pad_to(pad_gate_cols(q["w_hh1"]), (HP, 4 * HP))
    b1 = pad_gate_cols(q["b1"])
    w_out = pad_to(q["w_out"], (HP, OUT_PAD))
    b_out = pad_to(q["b_out"], (1, OUT_PAD))

    fused = {
        "w0x":   w_inp @ w_ih0,           # (IN_PAD, 4*HP)  input Linear folded into layer-0 ih
        "b0":    b_inp @ w_ih0 + b0,      # (1, 4*HP)
        "w_hh0": w_hh0,                   # (HP, 4*HP)
        "w_ih1": w_ih1,                   # (HP, 4*HP)
        "w_hh1": w_hh1,                   # (HP, 4*HP)
        "b1":    b1,                      # (1, 4*HP)
        "w_out": w_out,                   # (HP, OUT_PAD)
        "b_out": b_out,                   # (1, OUT_PAD)
    }
    return {k: jnp.asarray(v, jnp.float32) for k, v in fused.items()}


def make_forward_fn(fused, steps):
    SP = ((steps + 7) // 8) * 8            # sublane-aligned number of time rows

    # Kernel A: one batched MXU matmul over all timesteps (input projection).
    proj_call = pl.pallas_call(
        input_proj_kernel,
        out_shape=jax.ShapeDtypeStruct((SP, 4 * HP), jnp.float32),
        grid=(1,),
        in_specs=[
            pl.BlockSpec((SP, IN_PAD), lambda i: (0, 0)),
            pl.BlockSpec((IN_PAD, 4 * HP), lambda i: (0, 0)),
            pl.BlockSpec((1, 4 * HP), lambda i: (0, 0)),
        ],
        out_specs=pl.BlockSpec((SP, 4 * HP), lambda i: (0, 0)),
    )

    # Kernel B: the sequential recurrence (whole timestep loop inside one pallas_call).
    const = lambda t, xz: (0, 0)
    grid_spec = pltpu.PrefetchScalarGridSpec(
        num_scalar_prefetch=1,                                          # xzero flags -> SMEM
        grid=(steps,),
        in_specs=[
            pl.BlockSpec((None, 1, 4 * HP), lambda t, xz: (t, 0, 0)),   # g0x row streamed per step
            pl.BlockSpec((HP, 4 * HP), const),                          # W_hh0 (VMEM-resident)
            pl.BlockSpec((HP, 4 * HP), const),                          # W_ih1
            pl.BlockSpec((HP, 4 * HP), const),                          # W_hh1
            pl.BlockSpec((1, 4 * HP), const),                           # b1
            pl.BlockSpec((HP, OUT_PAD), const),                         # W_out
            pl.BlockSpec((1, OUT_PAD), const),                          # b_out
        ],
        out_specs=(
            pl.BlockSpec((None, 1, OUT_PAD), lambda t, xz: (t, 0, 0)),  # y sequence
            pl.BlockSpec((1, HP), const),                               # h layer 0 (resident)
            pl.BlockSpec((1, HP), const),                               # c layer 0
            pl.BlockSpec((1, HP), const),                               # h layer 1
            pl.BlockSpec((1, HP), const),                               # c layer 1
        ),
        scratch_shapes=[
            pltpu.SMEM((1,), jnp.int32),                                # "loop still live" flag
        ],
    )
    seq_call = pl.pallas_call(
        rnn_seq_kernel,
        out_shape=(
            jax.ShapeDtypeStruct((steps, 1, OUT_PAD), jnp.float32),
            jax.ShapeDtypeStruct((1, HP), jnp.float32),
            jax.ShapeDtypeStruct((1, HP), jnp.float32),
            jax.ShapeDtypeStruct((1, HP), jnp.float32),
            jax.ShapeDtypeStruct((1, HP), jnp.float32),
        ),
        grid_spec=grid_spec,
        compiler_params=pltpu.CompilerParams(
            dimension_semantics=("arbitrary",)),    # recurrent carry -> sequential grid
    )

    @jax.jit
    def forward(inputs):
        x = jnp.pad(inputs, ((0, SP - steps), (0, IN_PAD - IN_DIM)))     # (SP, IN_PAD)
        g0x = proj_call(x, fused["w0x"], fused["b0"])                    # (SP, 4*HP)
        g0x = g0x.reshape(SP, 1, 4 * HP)
        xzero = (jnp.sum(inputs, axis=-1) == 0.0).astype(jnp.int32)      # (steps,) stop flags
        y, h0, c0, h1, c1 = seq_call(xzero, g0x,
                                     fused["w_hh0"], fused["w_ih1"], fused["w_hh1"],
                                     fused["b1"], fused["w_out"], fused["b_out"])
        outputs = y[:steps - 1, 0, :IN_DIM]                        # torch: (steps-1, 300)
        h_n = jnp.stack([h0[:, :HIDDEN], h1[:, :HIDDEN]], axis=0)  # (2, 1, 100)
        c_n = jnp.stack([c0[:, :HIDDEN], c1[:, :HIDDEN]], axis=0)
        return outputs, (h_n, c_n)

    return forward


def reference_forward(p, inputs_np):
    """Pure numpy mirror of SimpleRNN.forward(force=True) with the original params."""
    def sig(x):
        return 1.0 / (1.0 + np.exp(-x))

    def cell(xin, h, c, w_ih, w_hh, b):
        g = xin @ w_ih + h @ w_hh + b
        i = sig(g[:, :HIDDEN]); f = sig(g[:, HIDDEN:2 * HIDDEN])
        gg = np.tanh(g[:, 2 * HIDDEN:3 * HIDDEN]); o = sig(g[:, 3 * HIDDEN:])
        c_new = f * c + i * gg
        return o * np.tanh(c_new), c_new

    q = {k: np.asarray(v, np.float32) for k, v in p.items()}
    steps = inputs_np.shape[0]
    outputs = np.zeros((steps - 1, IN_DIM), np.float32)
    h0 = c0 = h1 = c1 = np.zeros((1, HIDDEN), np.float32)
    i = 0
    while True:
        x = inputs_np[i].reshape(1, IN_DIM)
        z = x @ q["w_inp"] + q["b_inp"]
        h0, c0 = cell(z, h0, c0, q["w_ih0"], q["w_hh0"], q["b0"])
        h1, c1 = cell(h0, h1, c1, q["w_ih1"], q["w_hh1"], q["b1"])
        y = h1 @ q["w_out"] + q["b_out"]
        if float(y[0].sum()) == 0.0 or float(inputs_np[i].sum()) == 0.0:
            break
        outputs[i] = y[0]
        i += 1
    return outputs, (np.stack([h0, h1], axis=0), np.stack([c0, c1], axis=0))


if __name__ == "__main__":
    key = jax.random.PRNGKey(0)
    pkey, xkey = jax.random.split(key)
    params = init_params(pkey)
    fused = prepare_fused_params(params)

    steps = 8
    inputs = jax.random.normal(xkey, (steps, IN_DIM), jnp.float32)
    inputs = inputs.at[steps - 1].set(0.0)   # zero row terminates the loop (as in typical usage)

    forward = make_forward_fn(fused, steps)
    outputs, (h_n, c_n) = forward(inputs)
    jax.block_until_ready((outputs, h_n, c_n))

    # Sanity check against a pure-numpy reference of the original (unpadded, unfused) module.
    ref_out, (ref_h, ref_c) = reference_forward(params, np.asarray(inputs))
    np.testing.assert_allclose(np.asarray(outputs), ref_out, rtol=5e-2, atol=5e-2)
    np.testing.assert_allclose(np.asarray(h_n), ref_h, rtol=5e-2, atol=5e-2)
    np.testing.assert_allclose(np.asarray(c_n), ref_c, rtol=5e-2, atol=5e-2)

    assert outputs.shape == (steps - 1, IN_DIM)
    assert h_n.shape == (2, 1, HIDDEN) and c_n.shape == (2, 1, HIDDEN)
    print("KERNEL_OK")
</pallas_src>

<mosaic_0001>
module attributes {stable_mosaic.version = 11 : i64} {
  func.func @input_proj_kernel(%arg0: i32, %arg1: memref<8x384xf32, #tpu.memory_space<vmem>>, %arg2: memref<384x512xf32, #tpu.memory_space<vmem>>, %arg3: memref<1x512xf32, #tpu.memory_space<vmem>>, %arg4: memref<8x512xf32, #tpu.memory_space<vmem>>) attributes {dimension_semantics = [#tpu.dimension_semantics<arbitrary>], iteration_bounds = array<i64: 1>, scalar_prefetch = 0 : i64, scratch_operands = 0 : i64, tpu.core_type = #tpu.core_type<tc>, window_params = [{pipeline_mode = #tpu.pipeline_mode<synchronous>, transform_indices = @transform_0, window_bounds = array<i64: 8, 384>}, {pipeline_mode = #tpu.pipeline_mode<synchronous>, transform_indices = @transform_1, window_bounds = array<i64: 384, 512>}, {pipeline_mode = #tpu.pipeline_mode<synchronous>, transform_indices = @transform_2, window_bounds = array<i64: 1, 512>}, {pipeline_mode = #tpu.pipeline_mode<synchronous>, transform_indices = @transform_3, window_bounds = array<i64: 8, 512>}]} {
    %c0 = arith.constant 0 : index
    %c0_0 = arith.constant 0 : index
    %0 = vector.load %arg1[%c0, %c0_0] : memref<8x384xf32, #tpu.memory_space<vmem>>, vector<8x384xf32>
    %c0_1 = arith.constant 0 : index
    %c0_2 = arith.constant 0 : index
    %1 = vector.load %arg2[%c0_1, %c0_2] : memref<384x512xf32, #tpu.memory_space<vmem>>, vector<384x512xf32>
    %cst = arith.constant dense<0.000000e+00> : vector<8x512xf32>
    %2 = tpu.matmul %0, %1, %cst {dimension_numbers = #tpu.dot_dimension_numbers<[1], [0], [0], [1], [0, 0, 1, 1], [], []>} : vector<8x384xf32>, vector<384x512xf32>, vector<8x512xf32> -> vector<8x512xf32>
    %c0_3 = arith.constant 0 : index
    %c0_4 = arith.constant 0 : index
    %3 = vector.load %arg3[%c0_3, %c0_4] : memref<1x512xf32, #tpu.memory_space<vmem>>, vector<1x512xf32>
    %4 = vector.broadcast %3 : vector<1x512xf32> to vector<8x512xf32>
    %5 = arith.addf %2, %4 : vector<8x512xf32>
    %c0_5 = arith.constant 0 : index
    %c0_6 = arith.constant 0 : index
    %6 = vector.load %arg4[%c0_5, %c0_6] : memref<8x512xf32, #tpu.memory_space<vmem>>, vector<8x512xf32>
    tpu.vector_store %arg4[%c0_5, %c0_6], %5 {strides = array<i32>} : memref<8x512xf32, #tpu.memory_space<vmem>>, vector<8x512xf32>,
    return
  }
  func.func @transform_0(%arg0: i32) -> (i32, i32) {
    %c0_i32 = arith.constant 0 : i32
    %c0_i32_0 = arith.constant 0 : i32
    %c0_i32_1 = arith.constant 0 : i32
    return %c0_i32, %c0_i32_0 : i32, i32
  }
  func.func @transform_1(%arg0: i32) -> (i32, i32) {
    %c0_i32 = arith.constant 0 : i32
    %c0_i32_0 = arith.constant 0 : i32
    %c0_i32_1 = arith.constant 0 : i32
    return %c0_i32, %c0_i32_0 : i32, i32
  }
  func.func @transform_2(%arg0: i32) -> (i32, i32) {
    %c0_i32 = arith.constant 0 : i32
    %c0_i32_0 = arith.constant 0 : i32
    %c0_i32_1 = arith.constant 0 : i32
    return %c0_i32, %c0_i32_0 : i32, i32
  }
  func.func @transform_3(%arg0: i32) -> (i32, i32) {
    %c0_i32 = arith.constant 0 : i32
    %c0_i32_0 = arith.constant 0 : i32
    %c0_i32_1 = arith.constant 0 : i32
    return %c0_i32, %c0_i32_0 : i32, i32
  }
}

module attributes {stable_mosaic.version = 11 : i64} {
  func.func @rnn_seq_kernel(%arg0: i32, %arg1: memref<8xi32, #tpu.memory_space<smem>>, %arg2: memref<1x1x512xf32, #tpu.memory_space<vmem>>, %arg3: memref<128x512xf32, #tpu.memory_space<vmem>>, %arg4: memref<128x512xf32, #tpu.memory_space<vmem>>, %arg5: memref<128x512xf32, #tpu.memory_space<vmem>>, %arg6: memref<1x512xf32, #tpu.memory_space<vmem>>, %arg7: memref<128x384xf32, #tpu.memory_space<vmem>>, %arg8: memref<1x384xf32, #tpu.memory_space<vmem>>, %arg9: memref<1x1x384xf32, #tpu.memory_space<vmem>>, %arg10: memref<1x128xf32, #tpu.memory_space<vmem>>, %arg11: memref<1x128xf32, #tpu.memory_space<vmem>>, %arg12: memref<1x128xf32, #tpu.memory_space<vmem>>, %arg13: memref<1x128xf32, #tpu.memory_space<vmem>>, %arg14: memref<1xi32, #tpu.memory_space<smem>>) attributes {dimension_semantics = [#tpu.dimension_semantics<arbitrary>], iteration_bounds = array<i64: 8>, scalar_prefetch = 1 : i64, scratch_operands = 1 : i64, tpu.core_type = #tpu.core_type<tc>, window_params = [{transform_indices = @transform_0, window_bounds = array<i64: 1, 1, 512>}, {pipeline_mode = #tpu.pipeline_mode<synchronous>, transform_indices = @transform_1, window_bounds = array<i64: 128, 512>}, {pipeline_mode = #tpu.pipeline_mode<synchronous>, transform_indices = @transform_2, window_bounds = array<i64: 128, 512>}, {pipeline_mode = #tpu.pipeline_mode<synchronous>, transform_indices = @transform_3, window_bounds = array<i64: 128, 512>}, {pipeline_mode = #tpu.pipeline_mode<synchronous>, transform_indices = @transform_4, window_bounds = array<i64: 1, 512>}, {pipeline_mode = #tpu.pipeline_mode<synchronous>, transform_indices = @transform_5, window_bounds = array<i64: 128, 384>}, {pipeline_mode = #tpu.pipeline_mode<synchronous>, transform_indices = @transform_6, window_bounds = array<i64: 1, 384>}, {transform_indices = @transform_7, window_bounds = array<i64: 1, 1, 384>}, {pipeline_mode = #tpu.pipeline_mode<synchronous>, transform_indices = @transform_8, window_bounds = array<i64: 1, 128>}, {pipeline_mode = #tpu.pipeline_mode<synchronous>, transform_indices = @transform_9, window_bounds = array<i64: 1, 128>}, {pipeline_mode = #tpu.pipeline_mode<synchronous>, transform_indices = @transform_10, window_bounds = array<i64: 1, 128>}, {pipeline_mode = #tpu.pipeline_mode<synchronous>, transform_indices = @transform_11, window_bounds = array<i64: 1, 128>}]} {
    %c0_i32 = arith.constant 0 : i32
    %0 = arith.cmpi eq, %arg0, %c0_i32 : i32
    %1 = arith.extui %0 : i1 to i32
    %c0_i32_0 = arith.constant 0 : i32
    %2 = arith.cmpi ne, %1, %c0_i32_0 : i32
    scf.if %2 {
      %cst = arith.constant 0.000000e+00 : f32
      %11 = vector.broadcast %cst : f32 to vector<1x128xf32>
      %c0_5 = arith.constant 0 : index
      %c0_6 = arith.constant 0 : index
      %12 = vector.load %arg10[%c0_5, %c0_6] : memref<1x128xf32, #tpu.memory_space<vmem>>, vector<1x128xf32>
      tpu.vector_store %arg10[%c0_5, %c0_6], %11 {strides = array<i32>} : memref<1x128xf32, #tpu.memory_space<vmem>>, vector<1x128xf32>,
      %cst_7 = arith.constant 0.000000e+00 : f32
      %13 = vector.broadcast %cst_7 : f32 to vector<1x128xf32>
      %c0_8 = arith.constant 0 : index
      %c0_9 = arith.constant 0 : index
      %14 = vector.load %arg11[%c0_8, %c0_9] : memref<1x128xf32, #tpu.memory_space<vmem>>, vector<1x128xf32>
      tpu.vector_store %arg11[%c0_8, %c0_9], %13 {strides = array<i32>} : memref<1x128xf32, #tpu.memory_space<vmem>>, vector<1x128xf32>,
      %cst_10 = arith.constant 0.000000e+00 : f32
      %15 = vector.broadcast %cst_10 : f32 to vector<1x128xf32>
      %c0_11 = arith.constant 0 : index
      %c0_12 = arith.constant 0 : index
      %16 = vector.load %arg12[%c0_11, %c0_12] : memref<1x128xf32, #tpu.memory_space<vmem>>, vector<1x128xf32>
      tpu.vector_store %arg12[%c0_11, %c0_12], %15 {strides = array<i32>} : memref<1x128xf32, #tpu.memory_space<vmem>>, vector<1x128xf32>,
      %cst_13 = arith.constant 0.000000e+00 : f32
      %17 = vector.broadcast %cst_13 : f32 to vector<1x128xf32>
      %c0_14 = arith.constant 0 : index
      %c0_15 = arith.constant 0 : index
      %18 = vector.load %arg13[%c0_14, %c0_15] : memref<1x128xf32, #tpu.memory_space<vmem>>, vector<1x128xf32>
      tpu.vector_store %arg13[%c0_14, %c0_15], %17 {strides = array<i32>} : memref<1x128xf32, #tpu.memory_space<vmem>>, vector<1x128xf32>,
      %c1_i32_16 = arith.constant 1 : i32
      %c0_17 = arith.constant 0 : index
      %19 = memref.load %arg14[%c0_17] : memref<1xi32, #tpu.memory_space<smem>>
      memref.store %c1_i32_16, %arg14[%c0_17] : memref<1xi32, #tpu.memory_space<smem>>
    } else {
    }
    %c0 = arith.constant 0 : index
    %3 = memref.load %arg14[%c0] : memref<1xi32, #tpu.memory_space<smem>>
    %c0_i32_1 = arith.constant 0 : i32
    %4 = arith.cmpi eq, %3, %c0_i32_1 : i32
    %5 = arith.extui %4 : i1 to i32
    %c0_i32_2 = arith.constant 0 : i32
    %6 = arith.cmpi ne, %5, %c0_i32_2 : i32
    scf.if %6 {
      %cst = arith.constant 0.000000e+00 : f32
      %11 = vector.broadcast %cst : f32 to vector<1x384xf32>
      %c0_5 = arith.constant 0 : index
      %c0_6 = arith.constant 0 : index
      %c0_7 = arith.constant 0 : index
      %12 = vector.load %arg9[%c0_5, %c0_6, %c0_7] : memref<1x1x384xf32, #tpu.memory_space<vmem>>, vector<1x1x384xf32>
      %13 = vector.shape_cast %12 : vector<1x1x384xf32> to vector<1x384xf32>
      %14 = vector.shape_cast %11 : vector<1x384xf32> to vector<1x1x384xf32>
      tpu.vector_store %arg9[%c0_5, %c0_6, %c0_7], %14 {strides = array<i32>} : memref<1x1x384xf32, #tpu.memory_space<vmem>>, vector<1x1x384xf32>,
    } else {
    }
    %c0_3 = arith.constant 0 : index
    %7 = memref.load %arg14[%c0_3] : memref<1xi32, #tpu.memory_space<smem>>
    %c1_i32 = arith.constant 1 : i32
    %8 = arith.cmpi eq, %7, %c1_i32 : i32
    %9 = arith.extui %8 : i1 to i32
    %c0_i32_4 = arith.constant 0 : i32
    %10 = arith.cmpi ne, %9, %c0_i32_4 : i32
    scf.if %10 {
      %c0_5 = arith.constant 0 : index
      %c0_6 = arith.constant 0 : index
      %11 = vector.load %arg10[%c0_5, %c0_6] : memref<1x128xf32, #tpu.memory_space<vmem>>, vector<1x128xf32>
      %c0_7 = arith.constant 0 : index
      %c0_8 = arith.constant 0 : index
      %12 = vector.load %arg11[%c0_7, %c0_8] : memref<1x128xf32, #tpu.memory_space<vmem>>, vector<1x128xf32>
      %c0_9 = arith.constant 0 : index
      %c0_10 = arith.constant 0 : index
      %13 = vector.load %arg12[%c0_9, %c0_10] : memref<1x128xf32, #tpu.memory_space<vmem>>, vector<1x128xf32>
      %c0_11 = arith.constant 0 : index
      %c0_12 = arith.constant 0 : index
      %14 = vector.load %arg13[%c0_11, %c0_12] : memref<1x128xf32, #tpu.memory_space<vmem>>, vector<1x128xf32>
      %c0_13 = arith.constant 0 : index
      %c0_14 = arith.constant 0 : index
      %c0_15 = arith.constant 0 : index
      %15 = vector.load %arg2[%c0_13, %c0_14, %c0_15] : memref<1x1x512xf32, #tpu.memory_space<vmem>>, vector<1x1x512xf32>
      %16 = vector.shape_cast %15 : vector<1x1x512xf32> to vector<1x512xf32>
      %c0_16 = arith.constant 0 : index
      %c0_17 = arith.constant 0 : index
      %17 = vector.load %arg3[%c0_16, %c0_17] : memref<128x512xf32, #tpu.memory_space<vmem>>, vector<128x512xf32>
      %cst = arith.constant dense<0.000000e+00> : vector<1x512xf32>
      %18 = tpu.matmul %11, %17, %cst {dimension_numbers = #tpu.dot_dimension_numbers<[1], [0], [0], [1], [0, 0, 1, 1], [], []>} : vector<1x128xf32>, vector<128x512xf32>, vector<1x512xf32> -> vector<1x512xf32>
      %19 = arith.addf %16, %18 : vector<1x512xf32>
      %20 = vector.extract_strided_slice %19 {offsets = [0, 0], sizes = [1, 128], strides = [1, 1]} : vector<1x512xf32> to vector<1x128xf32>
      %21 = arith.negf %20 : vector<1x128xf32>
      %22 = math.exp %21 : vector<1x128xf32>
      %cst_18 = arith.constant 1.000000e+00 : f32
      %23 = vector.broadcast %cst_18 : f32 to vector<1x128xf32>
      %24 = arith.addf %23, %22 : vector<1x128xf32>
      %25 = arith.divf %23, %24 : vector<1x128xf32>
      %26 = vector.extract_strided_slice %19 {offsets = [0, 128], sizes = [1, 128], strides = [1, 1]} : vector<1x512xf32> to vector<1x128xf32>
      %27 = arith.negf %26 : vector<1x128xf32>
      %28 = math.exp %27 : vector<1x128xf32>
      %cst_19 = arith.constant 1.000000e+00 : f32
      %29 = vector.broadcast %cst_19 : f32 to vector<1x128xf32>
      %30 = arith.addf %29, %28 : vector<1x128xf32>
      %31 = arith.divf %29, %30 : vector<1x128xf32>
      %32 = vector.extract_strided_slice %19 {offsets = [0, 256], sizes = [1, 128], strides = [1, 1]} : vector<1x512xf32> to vector<1x128xf32>
      %33 = math.tanh %32 : vector<1x128xf32>
      %34 = vector.extract_strided_slice %19 {offsets = [0, 384], sizes = [1, 128], strides = [1, 1]} : vector<1x512xf32> to vector<1x128xf32>
      %35 = arith.negf %34 : vector<1x128xf32>
      %36 = math.exp %35 : vector<1x128xf32>
      %cst_20 = arith.constant 1.000000e+00 : f32
      %37 = vector.broadcast %cst_20 : f32 to vector<1x128xf32>
      %38 = arith.addf %37, %36 : vector<1x128xf32>
      %39 = arith.divf %37, %38 : vector<1x128xf32>
      %40 = arith.mulf %31, %12 : vector<1x128xf32>
      %41 = arith.mulf %25, %33 : vector<1x128xf32>
      %42 = arith.addf %40, %41 : vector<1x128xf32>
      %43 = math.tanh %42 : vector<1x128xf32>
      %44 = arith.mulf %39, %43 : vector<1x128xf32>
      %c0_21 = arith.constant 0 : index
      %c0_22 = arith.constant 0 : index
      %45 = vector.load %arg4[%c0_21, %c0_22] : memref<128x512xf32, #tpu.memory_space<vmem>>, vector<128x512xf32>
      %cst_23 = arith.constant dense<0.000000e+00> : vector<1x512xf32>
      %46 = tpu.matmul %44, %45, %cst_23 {dimension_numbers = #tpu.dot_dimension_numbers<[1], [0], [0], [1], [0, 0, 1, 1], [], []>} : vector<1x128xf32>, vector<128x512xf32>, vector<1x512xf32> -> vector<1x512xf32>
      %c0_24 = arith.constant 0 : index
      %c0_25 = arith.constant 0 : index
      %47 = vector.load %arg5[%c0_24, %c0_25] : memref<128x512xf32, #tpu.memory_space<vmem>>, vector<128x512xf32>
      %cst_26 = arith.constant dense<0.000000e+00> : vector<1x512xf32>
      %48 = tpu.matmul %13, %47, %cst_26 {dimension_numbers = #tpu.dot_dimension_numbers<[1], [0], [0], [1], [0, 0, 1, 1], [], []>} : vector<1x128xf32>, vector<128x512xf32>, vector<1x512xf32> -> vector<1x512xf32>
      %49 = arith.addf %46, %48 : vector<1x512xf32>
      %c0_27 = arith.constant 0 : index
      %c0_28 = arith.constant 0 : index
      %50 = vector.load %arg6[%c0_27, %c0_28] : memref<1x512xf32, #tpu.memory_space<vmem>>, vector<1x512xf32>
      %51 = arith.addf %49, %50 : vector<1x512xf32>
      %52 = vector.extract_strided_slice %51 {offsets = [0, 0], sizes = [1, 128], strides = [1, 1]} : vector<1x512xf32> to vector<1x128xf32>
      %53 = arith.negf %52 : vector<1x128xf32>
      %54 = math.exp %53 : vector<1x128xf32>
      %cst_29 = arith.constant 1.000000e+00 : f32
      %55 = vector.broadcast %cst_29 : f32 to vector<1x128xf32>
      %56 = arith.addf %55, %54 : vector<1x128xf32>
      %57 = arith.divf %55, %56 : vector<1x128xf32>
      %58 = vector.extract_strided_slice %51 {offsets = [0, 128], sizes = [1, 128], strides = [1, 1]} : vector<1x512xf32> to vector<1x128xf32>
      %59 = arith.negf %58 : vector<1x128xf32>
      %60 = math.exp %59 : vector<1x128xf32>
      %cst_30 = arith.constant 1.000000e+00 : f32
      %61 = vector.broadcast %cst_30 : f32 to vector<1x128xf32>
      %62 = arith.addf %61, %60 : vector<1x128xf32>
      %63 = arith.divf %61, %62 : vector<1x128xf32>
      %64 = vector.extract_strided_slice %51 {offsets = [0, 256], sizes = [1, 128], strides = [1, 1]} : vector<1x512xf32> to vector<1x128xf32>
      %65 = math.tanh %64 : vector<1x128xf32>
      %66 = vector.extract_strided_slice %51 {offsets = [0, 384], sizes = [1, 128], strides = [1, 1]} : vector<1x512xf32> to vector<1x128xf32>
      %67 = arith.negf %66 : vector<1x128xf32>
      %68 = math.exp %67 : vector<1x128xf32>
      %cst_31 = arith.constant 1.000000e+00 : f32
      %69 = vector.broadcast %cst_31 : f32 to vector<1x128xf32>
      %70 = arith.addf %69, %68 : vector<1x128xf32>
      %71 = arith.divf %69, %70 : vector<1x128xf32>
      %72 = arith.mulf %63, %14 : vector<1x128xf32>
      %73 = arith.mulf %57, %65 : vector<1x128xf32>
      %74 = arith.addf %72, %73 : vector<1x128xf32>
      %75 = math.tanh %74 : vector<1x128xf32>
      %76 = arith.mulf %71, %75 : vector<1x128xf32>
      %c0_32 = arith.constant 0 : index
      %c0_33 = arith.constant 0 : index
      %77 = vector.load %arg7[%c0_32, %c0_33] : memref<128x384xf32, #tpu.memory_space<vmem>>, vector<128x384xf32>
      %cst_34 = arith.constant dense<0.000000e+00> : vector<1x384xf32>
      %78 = tpu.matmul %76, %77, %cst_34 {dimension_numbers = #tpu.dot_dimension_numbers<[1], [0], [0], [1], [0, 0, 1, 1], [], []>} : vector<1x128xf32>, vector<128x384xf32>, vector<1x384xf32> -> vector<1x384xf32>
      %c0_35 = arith.constant 0 : index
      %c0_36 = arith.constant 0 : index
      %79 = vector.load %arg8[%c0_35, %c0_36] : memref<1x384xf32, #tpu.memory_space<vmem>>, vector<1x384xf32>
      %80 = arith.addf %78, %79 : vector<1x384xf32>
      %81 = vector.shape_cast %80 : vector<1x384xf32> to vector<1x1x384xf32>
      %cst_37 = arith.constant dense<0.000000e+00> : vector<1xf32>
      %82 = vector.multi_reduction <add>, %81, %cst_37 [1, 2] : vector<1x1x384xf32> to vector<1xf32>
      %83 = vector.shape_cast %82 : vector<1xf32> to vector<1x1x1xf32>
      %84 = vector.extract %83[0, 0, 0] : f32 from vector<1x1x1xf32>
      %cst_38 = arith.constant 0.000000e+00 : f32
      %85 = arith.cmpf oeq, %84, %cst_38 : f32
      %86 = arith.index_cast %arg0 : i32 to index
      %87 = memref.load %arg1[%86] : memref<8xi32, #tpu.memory_space<smem>>
      %c1_i32_39 = arith.constant 1 : i32
      %88 = arith.cmpi eq, %87, %c1_i32_39 : i32
      %89 = arith.ori %85, %88 : i1
      %c0_40 = arith.constant 0 : index
      %c0_41 = arith.constant 0 : index
      %90 = vector.load %arg10[%c0_40, %c0_41] : memref<1x128xf32, #tpu.memory_space<vmem>>, vector<1x128xf32>
      tpu.vector_store %arg10[%c0_40, %c0_41], %44 {strides = array<i32>} : memref<1x128xf32, #tpu.memory_space<vmem>>, vector<1x128xf32>,
      %c0_42 = arith.constant 0 : index
      %c0_43 = arith.constant 0 : index
      %91 = vector.load %arg11[%c0_42, %c0_43] : memref<1x128xf32, #tpu.memory_space<vmem>>, vector<1x128xf32>
      tpu.vector_store %arg11[%c0_42, %c0_43], %42 {strides = array<i32>} : memref<1x128xf32, #tpu.memory_space<vmem>>, vector<1x128xf32>,
      %c0_44 = arith.constant 0 : index
      %c0_45 = arith.constant 0 : index
      %92 = vector.load %arg12[%c0_44, %c0_45] : memref<1x128xf32, #tpu.memory_space<vmem>>, vector<1x128xf32>
      tpu.vector_store %arg12[%c0_44, %c0_45], %76 {strides = array<i32>} : memref<1x128xf32, #tpu.memory_space<vmem>>, vector<1x128xf32>,
      %c0_46 = arith.constant 0 : index
      %c0_47 = arith.constant 0 : index
      %93 = vector.load %arg13[%c0_46, %c0_47] : memref<1x128xf32, #tpu.memory_space<vmem>>, vector<1x128xf32>
      tpu.vector_store %arg13[%c0_46, %c0_47], %74 {strides = array<i32>} : memref<1x128xf32, #tpu.memory_space<vmem>>, vector<1x128xf32>,
      %cst_48 = arith.constant 0.000000e+00 : f32
      %94 = vector.broadcast %cst_48 : f32 to vector<1x384xf32>
      %95 = arith.select %89, %94, %80 : vector<1x384xf32>
      %c0_49 = arith.constant 0 : index
      %c0_50 = arith.constant 0 : index
      %c0_51 = arith.constant 0 : index
      %96 = vector.load %arg9[%c0_49, %c0_50, %c0_51] : memref<1x1x384xf32, #tpu.memory_space<vmem>>, vector<1x1x384xf32>
      %97 = vector.shape_cast %96 : vector<1x1x384xf32> to vector<1x384xf32>
      %98 = vector.shape_cast %95 : vector<1x384xf32> to vector<1x1x384xf32>
      tpu.vector_store %arg9[%c0_49, %c0_50, %c0_51], %98 {strides = array<i32>} : memref<1x1x384xf32, #tpu.memory_space<vmem>>, vector<1x1x384xf32>,
      %c0_i32_52 = arith.constant 0 : i32
      %c1_i32_53 = arith.constant 1 : i32
      %99 = arith.select %89, %c0_i32_52, %c1_i32_53 : i32
      %c0_54 = arith.constant 0 : index
      %100 = memref.load %arg14[%c0_54] : memref<1xi32, #tpu.memory_space<smem>>
      memref.store %99, %arg14[%c0_54] : memref<1xi32, #tpu.memory_space<smem>>
    } else {
    }
    return
  }
  func.func @transform_0(%arg0: i32, %arg1: memref<8xi32, #tpu.memory_space<smem>>) -> (i32, i32, i32) {
    %c0_i32 = arith.constant 0 : i32
    %c0_i32_0 = arith.constant 0 : i32
    %c0_i32_1 = arith.constant 0 : i32
    return %arg0, %c0_i32, %c0_i32_0 : i32, i32, i32
  }
  func.func @transform_1(%arg0: i32, %arg1: memref<8xi32, #tpu.memory_space<smem>>) -> (i32, i32) {
    %c0_i32 = arith.constant 0 : i32
    %c0_i32_0 = arith.constant 0 : i32
    %c0_i32_1 = arith.constant 0 : i32
    return %c0_i32, %c0_i32_0 : i32, i32
  }
  func.func @transform_2(%arg0: i32, %arg1: memref<8xi32, #tpu.memory_space<smem>>) -> (i32, i32) {
    %c0_i32 = arith.constant 0 : i32
    %c0_i32_0 = arith.constant 0 : i32
    %c0_i32_1 = arith.constant 0 : i32
    return %c0_i32, %c0_i32_0 : i32, i32
  }
  func.func @transform_3(%arg0: i32, %arg1: memref<8xi32, #tpu.memory_space<smem>>) -> (i32, i32) {
    %c0_i32 = arith.constant 0 : i32
    %c0_i32_0 = arith.constant 0 : i32
    %c0_i32_1 = arith.constant 0 : i32
    return %c0_i32, %c0_i32_0 : i32, i32
  }
  func.func @transform_4(%arg0: i32, %arg1: memref<8xi32, #tpu.memory_space<smem>>) -> (i32, i32) {
    %c0_i32 = arith.constant 0 : i32
    %c0_i32_0 = arith.constant 0 : i32
    %c0_i32_1 = arith.constant 0 : i32
    return %c0_i32, %c0_i32_0 : i32, i32
  }
  func.func @transform_5(%arg0: i32, %arg1: memref<8xi32, #tpu.memory_space<smem>>) -> (i32, i32) {
    %c0_i32 = arith.constant 0 : i32
    %c0_i32_0 = arith.constant 0 : i32
    %c0_i32_1 = arith.constant 0 : i32
    return %c0_i32, %c0_i32_0 : i32, i32
  }
  func.func @transform_6(%arg0: i32, %arg1: memref<8xi32, #tpu.memory_space<smem>>) -> (i32, i32) {
    %c0_i32 = arith.constant 0 : i32
    %c0_i32_0 = arith.constant 0 : i32
    %c0_i32_1 = arith.constant 0 : i32
    return %c0_i32, %c0_i32_0 : i32, i32
  }
  func.func @transform_7(%arg0: i32, %arg1: memref<8xi32, #tpu.memory_space<smem>>) -> (i32, i32, i32) {
    %c0_i32 = arith.constant 0 : i32
    %c0_i32_0 = arith.constant 0 : i32
    %c0_i32_1 = arith.constant 0 : i32
    return %arg0, %c0_i32, %c0_i32_0 : i32, i32, i32
  }
  func.func @transform_8(%arg0: i32, %arg1: memref<8xi32, #tpu.memory_space<smem>>) -> (i32, i32) {
    %c0_i32 = arith.constant 0 : i32
    %c0_i32_0 = arith.constant 0 : i32
    %c0_i32_1 = arith.constant 0 : i32
    return %c0_i32, %c0_i32_0 : i32, i32
  }
  func.func @transform_9(%arg0: i32, %arg1: memref<8xi32, #tpu.memory_space<smem>>) -> (i32, i32) {
    %c0_i32 = arith.constant 0 : i32
    %c0_i32_0 = arith.constant 0 : i32
    %c0_i32_1 = arith.constant 0 : i32
    return %c0_i32, %c0_i32_0 : i32, i32
  }
  func.func @transform_10(%arg0: i32, %arg1: memref<8xi32, #tpu.memory_space<smem>>) -> (i32, i32) {
    %c0_i32 = arith.constant 0 : i32
    %c0_i32_0 = arith.constant 0 : i32
    %c0_i32_1 = arith.constant 0 : i32
    return %c0_i32, %c0_i32_0 : i32, i32
  }
  func.func @transform_11(%arg0: i32, %arg1: memref<8xi32, #tpu.memory_space<smem>>) -> (i32, i32) {
    %c0_i32 = arith.constant 0 : i32
    %c0_i32_0 = arith.constant 0 : i32
    %c0_i32_1 = arith.constant 0 : i32
    return %c0_i32, %c0_i32_0 : i32, i32
  }
}

</mosaic_0001>

<bundles_post_ra>
// kernel: forward.2
= control target key start
LH: loop header
LB: loop body
LE: loop exit
PB: predicated region body
PF: predicated region fallthrough
CT: control target
= control target key end

     0   :  { %8 = vsyncpa [#allocation3], 0  ;;  %s564_s12 = smov [#allocation2]   ;;  %s629_s0 = inlined_call_operand.vmem [shape: f32[8,384], index: 0, kind: input, shape index: {}]   ;;  %s630_s1 = inlined_call_operand.hbm [shape: f32[384,512], index: 1, kind: input, shape index: {}]   ;;  %s631_s2 = inlined_call_operand.vmem [shape: f32[1,512], index: 2, kind: input, shape index: {}]   ;;  %s632_s3 = inlined_call_operand.vmem [shape: f32[8,512], index: 3, kind: output, shape index: {}]  }
   0x1   :  { %s16_s13 = sshll.u32 %s564_s12, 4  ;;  %s17_s13 = int_to_ptr.vmem [resolvable:$true] %s16_s13 }
   0x2   :  { %s550_s14 = scalar_lea.vmem %s17_s13, 24576  ;;  %p555_p1 = scmp.lt.s32.totalorder %s17_s13, %s17_s13 }
   0x3   :  { %p551_p0 = scmp.ne.s32.totalorder %s17_s13, %s550_s14  ;;  %p556_p2 = scmp.lt.s32.totalorder %s550_s14, %s550_s14 }
   0x5   :  { %p557_p3 = por %p556_p2, %p555_p1 }
   0x7   :  { %p558_p4 = pnand %p557_p3, %p551_p0 }
   0x9   :  { %561 = shalt.err (!%p558_p4)
}
   0xa   :  { %s565_s15 = smov 512   ;;  %s566_s16 = smov 32  }
   0xb   :  { %22 = dma.hbm_to_vmem [thread:$0]  %s630_s1, 24576, %s17_s13, [#allocation3], %s565_s15, %s565_s15, %s566_s16  }
   0xc   :  { %562 = dma.done.wait [#allocation3], 24576  }
   0xd   :  { %563 = vsyncadd [#allocation3], 4294942720  ;;  %v567_v0 = vmov 0.0   ;;  %v92_v1 = vld [vmem:[#allocation2 + $0x1e8] sm:$0xff]  ;;  %v91_v3 = vld [vmem:[#allocation2 + $0x1e0] sm:$0xff] }
   0xe   :  { %380 = vmatprep.mubr.f32.mxu1 %v567_v0  ;;  %v220_v2 = vld [vmem:[#allocation2 + $0x5e8] sm:$0xff]  ;;  %245 = vmatprep.subr.mxu0 %v92_v1  ;;  %v219_v4 = vld [vmem:[#allocation2 + $0x5e0] sm:$0xff] }
   0xf   :  { %316 = vmatprep.subr.mxu1 %v220_v2  ;;  %v88_v5 = vld [vmem:[#allocation2 + $0x1c8] sm:$0xff]  ;;  %246 = vmatpush1.msra.mxu0 %v91_v3  ;;  %v87_v7 = vld [vmem:[#allocation2 + $0x1c0] sm:$0xff]  ;;  %v595_v3 = vld [vmem:[%s629_s0 + $0x10] sm:$0xff] }
  0x10   :  { %v216_v6 = vld [vmem:[#allocation2 + $0x5c8] sm:$0xff]  ;;  %317 = vmatpush1.msra.mxu1 %v219_v4  ;;  %v215_v8 = vld [vmem:[#allocation2 + $0x5c0] sm:$0xff]  ;;  %247 = vmatprep.subr.mxu0 %v88_v5  ;;  %v94_v4 = vld [vmem:[#allocation2 + $0x1f8] sm:$0xff] }
  0x11   :  { %v84_v9 = vld [vmem:[#allocation2 + $0x1a8] sm:$0xff]  ;;  %318 = vmatprep.subr.mxu1 %v216_v6  ;;  %v83_v11 = vld [vmem:[#allocation2 + $0x1a0] sm:$0xff]  ;;  %248 = vmatpush1.msra.mxu0 %v87_v7  ;;  %v93_v6 = vld [vmem:[#allocation2 + $0x1f0] sm:$0xff] }
  0x12   :  { %v212_v10 = vld [vmem:[#allocation2 + $0x5a8] sm:$0xff]  ;;  %v211_v12 = vld [vmem:[#allocation2 + $0x5a0] sm:$0xff]  ;;  %319 = vmatpush1.msra.mxu1 %v215_v8  ;;  %249 = vmatprep.subr.mxu0 %v84_v9  ;;  %v90_v8 = vld [vmem:[#allocation2 + $0x1d8] sm:$0xff] }
  0x13   :  { %v80_v13 = vld [vmem:[#allocation2 + $0x188] sm:$0xff]  ;;  %320 = vmatprep.subr.mxu1 %v212_v10  ;;  %v79_v15 = vld [vmem:[#allocation2 + $0x180] sm:$0xff]  ;;  %250 = vmatpush1.msra.mxu0 %v83_v11  ;;  %v89_v10 = vld [vmem:[#allocation2 + $0x1d0] sm:$0xff] }
  0x14   :  { %v208_v14 = vld [vmem:[#allocation2 + $0x588] sm:$0xff]  ;;  %v207_v16 = vld [vmem:[#allocation2 + $0x580] sm:$0xff]  ;;  %321 = vmatpush1.msra.mxu1 %v211_v12  ;;  %251 = vmatprep.subr.mxu0 %v80_v13  ;;  %v86_v12 = vld [vmem:[#allocation2 + $0x1b8] sm:$0xff] }
  0x15   :  { %v76_v17 = vld [vmem:[#allocation2 + $0x168] sm:$0xff]  ;;  %322 = vmatprep.subr.mxu1 %v208_v14  ;;  %v75_v19 = vld [vmem:[#allocation2 + $0x160] sm:$0xff]  ;;  %252 = vmatpush1.msra.mxu0 %v79_v15  ;;  %v85_v14 = vld [vmem:[#allocation2 + $0x1b0] sm:$0xff] }
  0x16   :  { %v204_v18 = vld [vmem:[#allocation2 + $0x568] sm:$0xff]  ;;  %v203_v20 = vld [vmem:[#allocation2 + $0x560] sm:$0xff]  ;;  %323 = vmatpush1.msra.mxu1 %v207_v16  ;;  %253 = vmatprep.subr.mxu0 %v76_v17  ;;  %v82_v16 = vld [vmem:[#allocation2 + $0x198] sm:$0xff] }
  0x17   :  { %v72_v21 = vld [vmem:[#allocation2 + $0x148] sm:$0xff]  ;;  %324 = vmatprep.subr.mxu1 %v204_v18  ;;  %v71_v23 = vld [vmem:[#allocation2 + $0x140] sm:$0xff]  ;;  %254 = vmatpush1.msra.mxu0 %v75_v19  ;;  %v81_v18 = vld [vmem:[#allocation2 + $0x190] sm:$0xff] }
  0x18   :  { %v200_v22 = vld [vmem:[#allocation2 + $0x548] sm:$0xff]  ;;  %v199_v24 = vld [vmem:[#allocation2 + $0x540] sm:$0xff]  ;;  %325 = vmatpush1.msra.mxu1 %v203_v20  ;;  %255 = vmatprep.subr.mxu0 %v72_v21  ;;  %v78_v20 = vld [vmem:[#allocation2 + $0x178] sm:$0xff] }
  0x19   :  { %v68_v25 = vld [vmem:[#allocation2 + $0x128] sm:$0xff]  ;;  %326 = vmatprep.subr.mxu1 %v200_v22  ;;  %v67_v27 = vld [vmem:[#allocation2 + $0x120] sm:$0xff]  ;;  %256 = vmatpush1.msra.mxu0 %v71_v23  ;;  %v77_v22 = vld [vmem:[#allocation2 + $0x170] sm:$0xff] }
  0x1a   :  { %v196_v26 = vld [vmem:[#allocation2 + $0x528] sm:$0xff]  ;;  %v195_v28 = vld [vmem:[#allocation2 + $0x520] sm:$0xff]  ;;  %327 = vmatpush1.msra.mxu1 %v199_v24  ;;  %257 = vmatprep.subr.mxu0 %v68_v25  ;;  %v74_v24 = vld [vmem:[#allocation2 + $0x158] sm:$0xff] }
  0x1b   :  { %v64_v29 = vld [vmem:[#allocation2 + $0x108] sm:$0xff]  ;;  %328 = vmatprep.subr.mxu1 %v196_v26  ;;  %v63_v31 = vld [vmem:[#allocation2 + $0x100] sm:$0xff]  ;;  %258 = vmatpush1.msra.mxu0 %v67_v27  ;;  %v73_v26 = vld [vmem:[#allocation2 + $0x150] sm:$0xff] }
  0x1c   :  { %v192_v30 = vld [vmem:[#allocation2 + $0x508] sm:$0xff]  ;;  %v191_v32 = vld [vmem:[#allocation2 + $0x500] sm:$0xff]  ;;  %329 = vmatpush1.msra.mxu1 %v195_v28  ;;  %259 = vmatprep.subr.mxu0 %v64_v29  ;;  %v70_v28 = vld [vmem:[#allocation2 + $0x138] sm:$0xff] }
  0x1d   :  { %v60_v33 = vld [vmem:[#allocation2 + $0xe8] sm:$0xff]  ;;  %330 = vmatprep.subr.mxu1 %v192_v30  ;;  %v59_v35 = vld [vmem:[#allocation2 + $0xe0] sm:$0xff]  ;;  %260 = vmatpush1.msra.mxu0 %v63_v31  ;;  %v69_v30 = vld [vmem:[#allocation2 + $0x130] sm:$0xff] }
  0x1e   :  { %v188_v34 = vld [vmem:[#allocation2 + $0x4e8] sm:$0xff]  ;;  %v187_v36 = vld [vmem:[#allocation2 + $0x4e0] sm:$0xff]  ;;  %331 = vmatpush1.msra.mxu1 %v191_v32  ;;  %261 = vmatprep.subr.mxu0 %v60_v33  ;;  %v66_v32 = vld [vmem:[#allocation2 + $0x118] sm:$0xff] }
  0x1f   :  { %v56_v37 = vld [vmem:[#allocation2 + $0xc8] sm:$0xff]  ;;  %332 = vmatprep.subr.mxu1 %v188_v34  ;;  %v55_v39 = vld [vmem:[#allocation2 + $0xc0] sm:$0xff]  ;;  %262 = vmatpush1.msra.mxu0 %v59_v35  ;;  %v65_v34 = vld [vmem:[#allocation2 + $0x110] sm:$0xff] }
  0x20   :  { %v184_v38 = vld [vmem:[#allocation2 + $0x4c8] sm:$0xff]  ;;  %v183_v40 = vld [vmem:[#allocation2 + $0x4c0] sm:$0xff]  ;;  %333 = vmatpush1.msra.mxu1 %v187_v36  ;;  %263 = vmatprep.subr.mxu0 %v56_v37  ;;  %v62_v36 = vld [vmem:[#allocation2 + $0xf8] sm:$0xff] }
  0x21   :  { %v52_v41 = vld [vmem:[#allocation2 + $0xa8] sm:$0xff]  ;;  %334 = vmatprep.subr.mxu1 %v184_v38  ;;  %v51_v43 = vld [vmem:[#allocation2 + $0xa0] sm:$0xff]  ;;  %264 = vmatpush1.msra.mxu0 %v55_v39  ;;  %v61_v38 = vld [vmem:[#allocation2 + $0xf0] sm:$0xff] }
  0x22   :  { %v180_v42 = vld [vmem:[#allocation2 + $0x4a8] sm:$0xff]  ;;  %v179_v44 = vld [vmem:[#allocation2 + $0x4a0] sm:$0xff]  ;;  %335 = vmatpush1.msra.mxu1 %v183_v40  ;;  %265 = vmatprep.subr.mxu0 %v52_v41  ;;  %v58_v40 = vld [vmem:[#allocation2 + $0xd8] sm:$0xff] }
  0x23   :  { %v48_v45 = vld [vmem:[#allocation2 + $0x88] sm:$0xff]  ;;  %336 = vmatprep.subr.mxu1 %v180_v42  ;;  %v47_v47 = vld [vmem:[#allocation2 + $0x80] sm:$0xff]  ;;  %266 = vmatpush1.msra.mxu0 %v51_v43  ;;  %v57_v42 = vld [vmem:[#allocation2 + $0xd0] sm:$0xff] }
  0x24   :  { %v176_v46 = vld [vmem:[#allocation2 + $0x488] sm:$0xff]  ;;  %v175_v48 = vld [vmem:[#allocation2 + $0x480] sm:$0xff]  ;;  %337 = vmatpush1.msra.mxu1 %v179_v44  ;;  %267 = vmatprep.subr.mxu0 %v48_v45  ;;  %v54_v44 = vld [vmem:[#allocation2 + $0xb8] sm:$0xff] }
  0x25   :  { %v44_v49 = vld [vmem:[#allocation2 + $0x68] sm:$0xff]  ;;  %338 = vmatprep.subr.mxu1 %v176_v46  ;;  %v43_v51 = vld [vmem:[#allocation2 + $0x60] sm:$0xff]  ;;  %268 = vmatpush1.msra.mxu0 %v47_v47  ;;  %v53_v46 = vld [vmem:[#allocation2 + $0xb0] sm:$0xff] }
  0x26   :  { %v172_v50 = vld [vmem:[#allocation2 + $0x468] sm:$0xff]  ;;  %v171_v52 = vld [vmem:[#allocation2 + $0x460] sm:$0xff]  ;;  %339 = vmatpush1.msra.mxu1 %v175_v48  ;;  %269 = vmatprep.subr.mxu0 %v44_v49  ;;  %v50_v48 = vld [vmem:[#allocation2 + $0x98] sm:$0xff] }
  0x27   :  { %v40_v53 = vld [vmem:[#allocation2 + $0x48] sm:$0xff]  ;;  %340 = vmatprep.subr.mxu1 %v172_v50  ;;  %v39_v55 = vld [vmem:[#allocation2 + $0x40] sm:$0xff]  ;;  %270 = vmatpush1.msra.mxu0 %v43_v51  ;;  %v49_v50 = vld [vmem:[#allocation2 + $0x90] sm:$0xff] }
  0x28   :  { %v168_v54 = vld [vmem:[#allocation2 + $0x448] sm:$0xff]  ;;  %v167_v56 = vld [vmem:[#allocation2 + $0x440] sm:$0xff]  ;;  %341 = vmatpush1.msra.mxu1 %v171_v52  ;;  %271 = vmatprep.subr.mxu0 %v40_v53  ;;  %v46_v52 = vld [vmem:[#allocation2 + $0x78] sm:$0xff] }
  0x29   :  { %v36_v57 = vld [vmem:[#allocation2 + $0x28] sm:$0xff]  ;;  %342 = vmatprep.subr.mxu1 %v168_v54  ;;  %v35_v59 = vld [vmem:[#allocation2 + $0x20] sm:$0xff]  ;;  %272 = vmatpush1.msra.mxu0 %v39_v55  ;;  %v45_v54 = vld [vmem:[#allocation2 + $0x70] sm:$0xff] }
  0x2a   :  { %v164_v58 = vld [vmem:[#allocation2 + $0x428] sm:$0xff]  ;;  %v163_v60 = vld [vmem:[#allocation2 + $0x420] sm:$0xff]  ;;  %343 = vmatpush1.msra.mxu1 %v167_v56  ;;  %273 = vmatprep.subr.mxu0 %v36_v57  ;;  %v42_v56 = vld [vmem:[#allocation2 + $0x58] sm:$0xff] }
  0x2b   :  { %v32_v61 = vld [vmem:[#allocation2 + $0x8] sm:$0xff]  ;;  %344 = vmatprep.subr.mxu1 %v164_v58  ;;  %v31_v63 = vld [vmem:[#allocation2] sm:$0xff]  ;;  %274 = vmatpush1.msra.mxu0 %v35_v59  ;;  %v41_v58 = vld [vmem:[#allocation2 + $0x50] sm:$0xff] }
  0x2c   :  { %v160_v62 = vld [vmem:[#allocation2 + $0x408] sm:$0xff]  ;;  %v159_v1 = vld [vmem:[#allocation2 + $0x400] sm:$0xff]  ;;  %345 = vmatpush1.msra.mxu1 %v163_v60  ;;  %275 = vmatprep.subr.mxu0 %v32_v61  ;;  %v38_v60 = vld [vmem:[#allocation2 + $0x38] sm:$0xff] }
  0x2d   :  { %v156_v2 = vld [vmem:[#allocation2 + $0x3e8] sm:$0xff]  ;;  %346 = vmatprep.subr.mxu1 %v160_v62  ;;  %v155_v5 = vld [vmem:[#allocation2 + $0x3e0] sm:$0xff]  ;;  %276 = vmatpush1.msra.mxu0 %v31_v63  ;;  %v37_v62 = vld [vmem:[#allocation2 + $0x30] sm:$0xff] }
  0x2e   :  { %347 = vmatpush1.msra.mxu1 %v159_v1  ;;  %v152_v7 = vld [vmem:[#allocation2 + $0x3c8] sm:$0xff]  ;;  %277 = vmatprep.subr.mxu0 %v156_v2  ;;  %v151_v9 = vld [vmem:[#allocation2 + $0x3c0] sm:$0xff]  ;;  %v34_v1 = vld [vmem:[#allocation2 + $0x18] sm:$0xff] }
  0x2f   :  { %381 = vmatmul.mubr.f32.vlgmr.msra.gmra.mxu1 %v595_v3  ;;  %387 = vmatprep.subr.mxu1 %v94_v4  ;;  %v148_v11 = vld [vmem:[#allocation2 + $0x3a8] sm:$0xff]  ;;  %v147_v13 = vld [vmem:[#allocation2 + $0x3a0] sm:$0xff] }
  0x30   :  { %278 = vmatpush2.msra.mxu0 %v155_v5  ;;  %388 = vmatpush1.msra.mxu1 %v93_v6  ;;  %v144_v15 = vld [vmem:[#allocation2 + $0x388] sm:$0xff]  ;;  %v143_v17 = vld [vmem:[#allocation2 + $0x380] sm:$0xff]  ;;  %v33_v5 = vld [vmem:[#allocation2 + $0x10] sm:$0xff] }
  0x31   :  { %279 = vmatprep.subr.mxu0 %v152_v7  ;;  %389 = vmatprep.subr.mxu1 %v90_v8  ;;  %v140_v19 = vld [vmem:[#allocation2 + $0x368] sm:$0xff]  ;;  %v139_v21 = vld [vmem:[#allocation2 + $0x360] sm:$0xff]  ;;  %v158_v7 = vld [vmem:[#allocation2 + $0x3f8] sm:$0xff] }
  0x32   :  { %280 = vmatpush2.msra.mxu0 %v151_v9  ;;  %390 = vmatpush1.msra.mxu1 %v89_v10  ;;  %v136_v23 = vld [vmem:[#allocation2 + $0x348] sm:$0xff]  ;;  %v135_v25 = vld [vmem:[#allocation2 + $0x340] sm:$0xff]  ;;  %v222_v8 = vld [vmem:[#allocation2 + $0x5f8] sm:$0xff] }
  0x33   :  { %281 = vmatprep.subr.mxu0 %v148_v11  ;;  %391 = vmatprep.subr.mxu1 %v86_v12  ;;  %v132_v27 = vld [vmem:[#allocation2 + $0x328] sm:$0xff]  ;;  %v131_v29 = vld [vmem:[#allocation2 + $0x320] sm:$0xff]  ;;  %v157_v9 = vld [vmem:[#allocation2 + $0x3f0] sm:$0xff] }
  0x34   :  { %282 = vmatpush2.msra.mxu0 %v147_v13  ;;  %392 = vmatpush1.msra.mxu1 %v85_v14  ;;  %v128_v31 = vld [vmem:[#allocation2 + $0x308] sm:$0xff]  ;;  %v127_v33 = vld [vmem:[#allocation2 + $0x300] sm:$0xff]  ;;  %v221_v10 = vld [vmem:[#allocation2 + $0x5f0] sm:$0xff] }
  0x35   :  { %283 = vmatprep.subr.mxu0 %v144_v15  ;;  %393 = vmatprep.subr.mxu1 %v82_v16  ;;  %v124_v35 = vld [vmem:[#allocation2 + $0x2e8] sm:$0xff]  ;;  %v123_v37 = vld [vmem:[#allocation2 + $0x2e0] sm:$0xff]  ;;  %v154_v11 = vld [vmem:[#allocation2 + $0x3d8] sm:$0xff] }
  0x36   :  { %284 = vmatpush2.msra.mxu0 %v143_v17  ;;  %394 = vmatpush1.msra.mxu1 %v81_v18  ;;  %v120_v39 = vld [vmem:[#allocation2 + $0x2c8] sm:$0xff]  ;;  %v119_v41 = vld [vmem:[#allocation2 + $0x2c0] sm:$0xff]  ;;  %v218_v12 = vld [vmem:[#allocation2 + $0x5d8] sm:$0xff] }
  0x37   :  { %285 = vmatprep.subr.mxu0 %v140_v19  ;;  %395 = vmatprep.subr.mxu1 %v78_v20  ;;  %v116_v43 = vld [vmem:[#allocation2 + $0x2a8] sm:$0xff]  ;;  %v115_v45 = vld [vmem:[#allocation2 + $0x2a0] sm:$0xff]  ;;  %v153_v13 = vld [vmem:[#allocation2 + $0x3d0] sm:$0xff] }
  0x38   :  { %286 = vmatpush2.msra.mxu0 %v139_v21  ;;  %396 = vmatpush1.msra.mxu1 %v77_v22  ;;  %v112_v47 = vld [vmem:[#allocation2 + $0x288] sm:$0xff]  ;;  %v111_v49 = vld [vmem:[#allocation2 + $0x280] sm:$0xff]  ;;  %v217_v14 = vld [vmem:[#allocation2 + $0x5d0] sm:$0xff] }
  0x39   :  { %287 = vmatprep.subr.mxu0 %v136_v23  ;;  %397 = vmatprep.subr.mxu1 %v74_v24  ;;  %v108_v51 = vld [vmem:[#allocation2 + $0x268] sm:$0xff]  ;;  %v107_v53 = vld [vmem:[#allocation2 + $0x260] sm:$0xff]  ;;  %v150_v15 = vld [vmem:[#allocation2 + $0x3b8] sm:$0xff] }
  0x3a   :  { %288 = vmatpush2.msra.mxu0 %v135_v25  ;;  %398 = vmatpush1.msra.mxu1 %v73_v26  ;;  %v104_v55 = vld [vmem:[#allocation2 + $0x248] sm:$0xff]  ;;  %v103_v57 = vld [vmem:[#allocation2 + $0x240] sm:$0xff]  ;;  %v214_v16 = vld [vmem:[#allocation2 + $0x5b8] sm:$0xff] }
  0x3b   :  { %289 = vmatprep.subr.mxu0 %v132_v27  ;;  %399 = vmatprep.subr.mxu1 %v70_v28  ;;  %v100_v59 = vld [vmem:[#allocation2 + $0x228] sm:$0xff]  ;;  %v99_v61 = vld [vmem:[#allocation2 + $0x220] sm:$0xff]  ;;  %v149_v17 = vld [vmem:[#allocation2 + $0x3b0] sm:$0xff] }
  0x3c   :  { %290 = vmatpush2.msra.mxu0 %v131_v29  ;;  %400 = vmatpush1.msra.mxu1 %v69_v30  ;;  %v96_v63 = vld [vmem:[#allocation2 + $0x208] sm:$0xff]  ;;  %v95_v2 = vld [vmem:[#allocation2 + $0x200] sm:$0xff]  ;;  %v213_v18 = vld [vmem:[#allocation2 + $0x5b0] sm:$0xff] }
  0x3d   :  { %291 = vmatprep.subr.mxu0 %v128_v31  ;;  %401 = vmatprep.subr.mxu1 %v66_v32  ;;  %v601_v4 = vld [vmem:[%s629_s0 + $0x8] sm:$0xff]  ;;  %v606_v6 = vld [vmem:[%s629_s0] sm:$0xff]  ;;  %v146_v19 = vld [vmem:[#allocation2 + $0x398] sm:$0xff] }
  0x3e   :  { %292 = vmatpush2.msra.mxu0 %v127_v33  ;;  %402 = vmatpush1.msra.mxu1 %v65_v34  ;;  %v210_v20 = vld [vmem:[#allocation2 + $0x598] sm:$0xff]  ;;  %v145_v21 = vld [vmem:[#allocation2 + $0x390] sm:$0xff] }
  0x3f   :  { %293 = vmatprep.subr.mxu0 %v124_v35  ;;  %403 = vmatprep.subr.mxu1 %v62_v36  ;;  %v209_v22 = vld [vmem:[#allocation2 + $0x590] sm:$0xff]  ;;  %v142_v23 = vld [vmem:[#allocation2 + $0x378] sm:$0xff] }
  0x40   :  { %294 = vmatpush2.msra.mxu0 %v123_v37  ;;  %404 = vmatpush1.msra.mxu1 %v61_v38  ;;  %v206_v24 = vld [vmem:[#allocation2 + $0x578] sm:$0xff]  ;;  %v141_v25 = vld [vmem:[#allocation2 + $0x370] sm:$0xff] }
  0x41   :  { %295 = vmatprep.subr.mxu0 %v120_v39  ;;  %405 = vmatprep.subr.mxu1 %v58_v40  ;;  %v205_v26 = vld [vmem:[#allocation2 + $0x570] sm:$0xff]  ;;  %v138_v27 = vld [vmem:[#allocation2 + $0x358] sm:$0xff] }
  0x42   :  { %296 = vmatpush2.msra.mxu0 %v119_v41  ;;  %406 = vmatpush1.msra.mxu1 %v57_v42  ;;  %v202_v28 = vld [vmem:[#allocation2 + $0x558] sm:$0xff]  ;;  %v137_v29 = vld [vmem:[#allocation2 + $0x350] sm:$0xff] }
  0x43   :  { %297 = vmatprep.subr.mxu0 %v116_v43  ;;  %407 = vmatprep.subr.mxu1 %v54_v44  ;;  %v201_v30 = vld [vmem:[#allocation2 + $0x550] sm:$0xff]  ;;  %v134_v31 = vld [vmem:[#allocation2 + $0x338] sm:$0xff] }
  0x44   :  { %298 = vmatpush2.msra.mxu0 %v115_v45  ;;  %408 = vmatpush1.msra.mxu1 %v53_v46  ;;  %v198_v32 = vld [vmem:[#allocation2 + $0x538] sm:$0xff]  ;;  %v133_v33 = vld [vmem:[#allocation2 + $0x330] sm:$0xff] }
  0x45   :  { %299 = vmatprep.subr.mxu0 %v112_v47  ;;  %409 = vmatprep.subr.mxu1 %v50_v48  ;;  %v197_v34 = vld [vmem:[#allocation2 + $0x530] sm:$0xff]  ;;  %v130_v35 = vld [vmem:[#allocation2 + $0x318] sm:$0xff] }
  0x46   :  { %300 = vmatpush2.msra.mxu0 %v111_v49  ;;  %410 = vmatpush1.msra.mxu1 %v49_v50  ;;  %v194_v36 = vld [vmem:[#allocation2 + $0x518] sm:$0xff]  ;;  %v129_v37 = vld [vmem:[#allocation2 + $0x310] sm:$0xff] }
  0x47   :  { %301 = vmatprep.subr.mxu0 %v108_v51  ;;  %411 = vmatprep.subr.mxu1 %v46_v52  ;;  %v193_v38 = vld [vmem:[#allocation2 + $0x510] sm:$0xff]  ;;  %v126_v39 = vld [vmem:[#allocation2 + $0x2f8] sm:$0xff] }
  0x48   :  { %302 = vmatpush2.msra.mxu0 %v107_v53  ;;  %412 = vmatpush1.msra.mxu1 %v45_v54  ;;  %v190_v40 = vld [vmem:[#allocation2 + $0x4f8] sm:$0xff]  ;;  %v125_v41 = vld [vmem:[#allocation2 + $0x2f0] sm:$0xff] }
  0x49   :  { %303 = vmatprep.subr.mxu0 %v104_v55  ;;  %413 = vmatprep.subr.mxu1 %v42_v56  ;;  %v189_v42 = vld [vmem:[#allocation2 + $0x4f0] sm:$0xff]  ;;  %v122_v43 = vld [vmem:[#allocation2 + $0x2d8] sm:$0xff] }
  0x4a   :  { %304 = vmatpush2.msra.mxu0 %v103_v57  ;;  %414 = vmatpush1.msra.mxu1 %v41_v58  ;;  %v186_v44 = vld [vmem:[#allocation2 + $0x4d8] sm:$0xff]  ;;  %v121_v45 = vld [vmem:[#allocation2 + $0x2d0] sm:$0xff] }
  0x4b   :  { %305 = vmatprep.subr.mxu0 %v100_v59  ;;  %415 = vmatprep.subr.mxu1 %v38_v60  ;;  %v185_v46 = vld [vmem:[#allocation2 + $0x4d0] sm:$0xff]  ;;  %v118_v47 = vld [vmem:[#allocation2 + $0x2b8] sm:$0xff] }
  0x4c   :  { %306 = vmatpush2.msra.mxu0 %v99_v61  ;;  %416 = vmatpush1.msra.mxu1 %v37_v62  ;;  %v182_v48 = vld [vmem:[#allocation2 + $0x4b8] sm:$0xff]  ;;  %v117_v49 = vld [vmem:[#allocation2 + $0x2b0] sm:$0xff] }
  0x4d   :  { %307 = vmatprep.subr.mxu0 %v96_v63  ;;  %417 = vmatprep.subr.mxu1 %v34_v1  ;;  %v181_v50 = vld [vmem:[#allocation2 + $0x4b0] sm:$0xff]  ;;  %v114_v51 = vld [vmem:[#allocation2 + $0x298] sm:$0xff] }
  0x4e   :  { %308 = vmatpush2.msra.mxu0 %v95_v2  ;;  %309 = vmatprep.mubr.f32.mxu0 %v601_v4  ;;  %v178_v52 = vld [vmem:[#allocation2 + $0x498] sm:$0xff]  ;;  %v113_v53 = vld [vmem:[#allocation2 + $0x290] sm:$0xff] }
  0x4f   :  { %418 = vmatpush1.msra.mxu1 %v33_v5  ;;  %310 = vmatmul.mubr.f32.vlgmr.msra.gmra.mxu0 %v606_v6  ;;  %v177_v54 = vld [vmem:[#allocation2 + $0x490] sm:$0xff]  ;;  %v110_v55 = vld [vmem:[#allocation2 + $0x278] sm:$0xff] }
  0x50   :  { %419 = vmatprep.subr.mxu1 %v158_v7  ;;  %458 = vmatprep.subr.mxu0 %v222_v8  ;;  %v174_v56 = vld [vmem:[#allocation2 + $0x478] sm:$0xff]  ;;  %v109_v57 = vld [vmem:[#allocation2 + $0x270] sm:$0xff] }
  0x51   :  { %420 = vmatpush2.msra.mxu1 %v157_v9  ;;  %459 = vmatpush1.msra.mxu0 %v221_v10  ;;  %v173_v58 = vld [vmem:[#allocation2 + $0x470] sm:$0xff]  ;;  %v106_v59 = vld [vmem:[#allocation2 + $0x258] sm:$0xff] }
  0x52   :  { %421 = vmatprep.subr.mxu1 %v154_v11  ;;  %460 = vmatprep.subr.mxu0 %v218_v12  ;;  %v170_v60 = vld [vmem:[#allocation2 + $0x458] sm:$0xff]  ;;  %v105_v61 = vld [vmem:[#allocation2 + $0x250] sm:$0xff]  ;;  %v225_v11 = vlaneseq }
  0x53   :  { %422 = vmatpush2.msra.mxu1 %v153_v13  ;;  %461 = vmatpush1.msra.mxu0 %v217_v14  ;;  %v169_v62 = vld [vmem:[#allocation2 + $0x450] sm:$0xff]  ;;  %v102_v63 = vld [vmem:[#allocation2 + $0x238] sm:$0xff]  ;;  %v223_v14 = vld [vmem:[%s631_s2] sm:$0xf] }
  0x54   :  { %423 = vmatprep.subr.mxu1 %v150_v15  ;;  %462 = vmatprep.subr.mxu0 %v214_v16  ;;  %v166_v1 = vld [vmem:[#allocation2 + $0x438] sm:$0xff]  ;;  %v101_v2 = vld [vmem:[#allocation2 + $0x230] sm:$0xff]  ;;  %v226_v12 = vshrl.u32 %v225_v11, 7 }
  0x55   :  { %424 = vmatpush2.msra.mxu1 %v149_v17  ;;  %463 = vmatpush1.msra.mxu0 %v213_v18  ;;  %v165_v5 = vld [vmem:[#allocation2 + $0x430] sm:$0xff]  ;;  %v98_v7 = vld [vmem:[#allocation2 + $0x218] sm:$0xff] }
  0x56   :  { %425 = vmatprep.subr.mxu1 %v146_v19  ;;  %464 = vmatprep.subr.mxu0 %v210_v20  ;;  %v162_v8 = vld [vmem:[#allocation2 + $0x418] sm:$0xff]  ;;  %v97_v9 = vld [vmem:[#allocation2 + $0x210] sm:$0xff]  ;;  %v227_v13 = vsub.s32 0, %v226_v12  ;;  %v231_v15 = vsub.s32 1, %v226_v12 }
  0x57   :  { %426 = vmatpush2.msra.mxu1 %v145_v21  ;;  %465 = vmatpush1.msra.mxu0 %v209_v22  ;;  %v161_v10 = vld [vmem:[#allocation2 + $0x410] sm:$0xff] }
  0x58   :  { %427 = vmatprep.subr.mxu1 %v142_v23  ;;  %466 = vmatprep.subr.mxu0 %v206_v24  ;;  %v228_v16 = vrot.slane %v223_v14, %v227_v13  ;;  %v232_v17 = vrot.slane %v223_v14, %v231_v15  ;;  %v239_v23 = vsub.s32 3, %v226_v12 }
  0x59   :  { %428 = vmatpush2.msra.mxu1 %v141_v25  ;;  %467 = vmatpush1.msra.mxu0 %v205_v26 }
  0x5a   :  { %429 = vmatprep.subr.mxu1 %v138_v27  ;;  %468 = vmatprep.subr.mxu0 %v202_v28  ;;  %v240_v25 = vrot.slane %v223_v14, %v239_v23 }
  0x5b   :  { %430 = vmatpush2.msra.mxu1 %v137_v29  ;;  %469 = vmatpush1.msra.mxu0 %v201_v30 }
  0x5c   :  { %431 = vmatprep.subr.mxu1 %v134_v31  ;;  %470 = vmatprep.subr.mxu0 %v198_v32 }
  0x5d   :  { %432 = vmatpush2.msra.mxu1 %v133_v33  ;;  %471 = vmatpush1.msra.mxu0 %v197_v34 }
  0x5e   :  { %433 = vmatprep.subr.mxu1 %v130_v35  ;;  %472 = vmatprep.subr.mxu0 %v194_v36 }
  0x5f   :  { %434 = vmatpush2.msra.mxu1 %v129_v37  ;;  %473 = vmatpush1.msra.mxu0 %v193_v38 }
  0x60   :  { %435 = vmatprep.subr.mxu1 %v126_v39  ;;  %474 = vmatprep.subr.mxu0 %v190_v40 }
  0x61   :  { %436 = vmatpush2.msra.mxu1 %v125_v41  ;;  %475 = vmatpush1.msra.mxu0 %v189_v42 }
  0x62   :  { %437 = vmatprep.subr.mxu1 %v122_v43  ;;  %476 = vmatprep.subr.mxu0 %v186_v44 }
  0x63   :  { %438 = vmatpush2.msra.mxu1 %v121_v45  ;;  %477 = vmatpush1.msra.mxu0 %v185_v46 }
  0x64   :  { %439 = vmatprep.subr.mxu1 %v118_v47  ;;  %478 = vmatprep.subr.mxu0 %v182_v48 }
  0x65   :  { %440 = vmatpush2.msra.mxu1 %v117_v49  ;;  %479 = vmatpush1.msra.mxu0 %v181_v50 }
  0x66   :  { %441 = vmatprep.subr.mxu1 %v114_v51  ;;  %480 = vmatprep.subr.mxu0 %v178_v52 }
  0x67   :  { %442 = vmatpush2.msra.mxu1 %v113_v53  ;;  %481 = vmatpush1.msra.mxu0 %v177_v54 }
  0x68   :  { %443 = vmatprep.subr.mxu1 %v110_v55  ;;  %482 = vmatprep.subr.mxu0 %v174_v56 }
  0x69   :  { %444 = vmatpush2.msra.mxu1 %v109_v57  ;;  %483 = vmatpush1.msra.mxu0 %v173_v58 }
  0x6a   :  { %445 = vmatprep.subr.mxu1 %v106_v59  ;;  %484 = vmatprep.subr.mxu0 %v170_v60 }
  0x6b   :  { %446 = vmatpush2.msra.mxu1 %v105_v61  ;;  %485 = vmatpush1.msra.mxu0 %v169_v62 }
  0x6c   :  { %447 = vmatprep.subr.mxu1 %v102_v63  ;;  %486 = vmatprep.subr.mxu0 %v166_v1 }
  0x6d   :  { %448 = vmatpush2.msra.mxu1 %v101_v2  ;;  %487 = vmatpush1.msra.mxu0 %v165_v5 }
  0x6e   :  { %449 = vmatprep.subr.mxu1 %v98_v7  ;;  %488 = vmatprep.subr.mxu0 %v162_v8 }
  0x6f   :  { %450 = vmatpush2.msra.mxu1 %v97_v9  ;;  %451 = vmatprep.mubr.f32.mxu1 %v601_v4 }
  0x70   :  { %489 = vmatpush1.msra.mxu0 %v161_v10  ;;  %522 = vmatprep.mubr.f32.mxu0 %v567_v0 }
  0x71   :  { %452 = vmatmul.mubr.f32.vlgmr.msra.gmra.mxu1 %v606_v6  ;;  %523 = vmatmul.mubr.f32.vlgmr.msra.gmra.mxu0 %v595_v3  ;;  %v235_v6 = vsub.s32 2, %v226_v12 }
  0x73   :  { %v236_v24 = vrot.slane %v223_v14, %v235_v6 }
  0xef   :  { %v382_v18 = vpop.f32.mrf.mxu1 }
  0xf1   :  { %v384_v22 = vpop.f32.mrf.mxu1 }
 0x10f   :  { %v311_v19 = vpop.f32.mrf.mxu0 }
 0x110   :  { %v312_v4 = vadd.f32 %v311_v19, %v228_v16 }
 0x111   :  { %v313_v20 = vpop.f32.mrf.mxu0 }
 0x112   :  { %v383_v21 = vadd.f32 %v382_v18, %v312_v4  ;;  %v314_v0 = vadd.f32 %v313_v20, %v232_v17 }
 0x114   :  { %529 = vst [vmem:[%s632_s3] sm:$0xff] %v383_v21  ;;  %v385_v3 = vadd.f32 %v384_v22, %v314_v0 }
 0x116   :  { %530 = vst [vmem:[%s632_s3 + $0x8] sm:$0xff] %v385_v3 }
 0x131   :  { %v453_v26 = vpop.f32.mrf.mxu1  ;;  %v524_v28 = vpop.f32.mrf.mxu0 }
 0x132   :  { %v454_v27 = vadd.f32 %v453_v26, %v236_v24 }
 0x133   :  { %v455_v29 = vpop.f32.mrf.mxu1  ;;  %v526_v32 = vpop.f32.mrf.mxu0 }
 0x134   :  { %v525_v30 = vadd.f32 %v524_v28, %v454_v27  ;;  %v456_v31 = vadd.f32 %v455_v29, %v240_v25 }
 0x136   :  { %531 = vst [vmem:[%s632_s3 + $0x10] sm:$0xff] %v525_v30  ;;  %v527_v33 = vadd.f32 %v526_v32, %v456_v31 }
 0x138   :  { %532 = vst [vmem:[%s632_s3 + $0x18] sm:$0xff] %v527_v33 }
 0x139   :  { %537 = vsyncpa [#allocation3], 1 }

// kernel: forward.3
= control target key start
LH: loop header
LB: loop body
LE: loop exit
PB: predicated region body
PF: predicated region fallthrough
CT: control target
= control target key end

     0   :  { %s2486_s0 = inlined_call_operand.vmem [shape: s32[8], index: 0, kind: input, shape index: {}]   ;;  %s2487_s1 = inlined_call_operand.vmem [shape: f32[8,1,512], index: 1, kind: input, shape index: {}]   ;;  %s2488_s2 = inlined_call_operand.vmem [shape: f32[128,512], index: 2, kind: input, shape index: {}]   ;;  %s2489_s3 = inlined_call_operand.vmem [shape: f32[128,512], index: 3, kind: input, shape index: {}]   ;;  %s2490_s4 = inlined_call_operand.vmem [shape: f32[128,512], index: 4, kind: input, shape index: {}]   ;;  %s2491_s5 = inlined_call_operand.vmem [shape: f32[1,512], index: 5, kind: input, shape index: {}]   ;;  %s2492_s6 = inlined_call_operand.hbm [shape: f32[128,384], index: 6, kind: input, shape index: {}]   ;;  %s2493_s7 = inlined_call_operand.vmem [shape: f32[1,384], index: 7, kind: input, shape index: {}]   ;;  %s2494_s8 = inlined_call_operand.vmem [shape: f32[8,1,384], index: 8, kind: output, shape index: {0}]   ;;  %s2495_s9 = inlined_call_operand.vmem [shape: f32[1,128], index: 9, kind: output, shape index: {1}]   ;;  %s2496_s10 = inlined_call_operand.vmem [shape: f32[1,128], index: 10, kind: output, shape index: {2}]   ;;  %s2497_s11 = inlined_call_operand.vmem [shape: f32[1,128], index: 11, kind: output, shape index: {3}]   ;;  %s2498_s12 = inlined_call_operand.vmem [shape: f32[1,128], index: 12, kind: output, shape index: {4}]  }
   0x1   :  { %s18_s23 = sshll.u32 %s2486_s0, 4  ;;  %s19_s23 = int_to_ptr.vmem [resolvable:$true] %s18_s23 }
   0x2   :  { %s1647_s24 = scalar_lea.vmem %s19_s23, 16  ;;  %p1652_p1 = scmp.lt.s32.totalorder %s19_s23, %s19_s23 }
   0x3   :  { %p1648_p0 = scmp.ne.s32.totalorder %s19_s23, %s1647_s24  ;;  %p1653_p2 = scmp.lt.s32.totalorder %s1647_s24, %s1647_s24 }
   0x5   :  { %p1654_p3 = por %p1653_p2, %p1652_p1 }
   0x7   :  { %p1655_p4 = pnand %p1654_p3, %p1648_p0 }
   0x9   :  { %1658 = shalt.err (!%p1655_p4)  }
   0xa   :  { %s1699_s25 = smov [#allocation4]  }
   0xb   :  { %21 = dma.vmem_to_smem %s19_s23, 16, %s1699_s25, [#allocation3] }
   0xc   :  { %1689 = dma.done.wait [#allocation3], 16 }
   0xd   :  { %1690 = vsyncadd [#allocation3], 4294967280 }
   0xe   :  { %23 = sfence }
   0xf   :  { %24 = vsyncpa [#allocation6], 0  ;;  %s1777_s26 = smov 0  }
  0x10 LB: > { %s1783_s0 = sadd.s32 4294967295, %s1697_s26   ;;  %p1514_p5 = scmp.ge.s32.totalorder %s1697_s26, 1  ;;  %s1697_s26 = sphi %s1777_s26, %s30_s26  }
  0x11   : > { %p297_p6 = scmp.lt.s32.totalorder %s1697_s26, 9  ;;  %s1700_s27 = smov [#allocation5]  }
  0x12   : > { %s321_s28 = sshll.u32 %s1700_s27, 4  ;;  %p1595_p9 = scmp.eq.s32.totalorder %s1783_s0, 0  ;;  %s322_s28 = int_to_ptr.vmem [resolvable:$true] %s321_s28 }
  0x13   : > { %p1788_p8 = pnand %p1514_p5, %p297_p6  ;;  %s1670_s30 = scalar_lea.vmem %s322_s28, 6144 }
  0x14   : > { %p1671_p13 = scmp.ne.s32.totalorder %s322_s28, %s1670_s30  ;;  %p1678_p2 = scmp.lt.s32.totalorder %s322_s28, %s322_s28 }
  0x15   : > { %p1591_p10 = pneg %p1788_p8  ;;  %p1679_p3 = scmp.lt.s32.totalorder %s1670_s30, %s1670_s30 }
  0x17   : > { %p1592_p11 = pnand %p1595_p9, %p1591_p10  ;;  %p1680_p4 = por %p1679_p3, %p1678_p2 }
  0x19   : > { %p1661_p12 = pneg %p1592_p11 }
  0x1b   : > { %p1673_p0 = pnand %p1671_p13, %p1661_p12 }
  0x1d   : > { %p1674_p1 = pneg %p1673_p0 }
  0x1f   : > { %p1681_p7 = pnand %p1680_p4, %p1674_p1 }
  0x21   : > { %1684 = shalt.err (!%p1681_p7)
}
  0x22   : > { %s1701_s13 = smov 384   ;;  %s1702_s14 = smov 24  }
  0x23   : > { %1594 = dma.hbm_to_vmem [thread:$0]  (!%p1592_p11), %s2492_s6, 6144, %s322_s28, [#allocation6], %s1701_s13, %s1701_s13, %s1702_s14  }
  0x24   : > { %347 = sbr.rel (%p1788_p8) target bundleno = 1047 (0x417), region = 48 }
  0x29   : > { %1692 = dma.done.wait (%p1595_p9), [#allocation6], 6144  }
  0x2a   : > { %1694 = vsyncadd (%p1595_p9), [#allocation6], 4294961152  ;;  %p385_p5 = scmp.lt.s32.totalorder %s1783_s0, 7  ;;  %p2500_p6 = scmp.ne.s32.totalorder %s1783_s0, 0 }
  0x2c   : > { %s386_s17 = scalar_select %p385_p5, %s1783_s0, 7 }
  0x2d   : > { %396 = sbr.rel (%p2500_p6) target bundleno = 53 (0x35), region = 56 }
  0x2e   : > { %s1519_s18 = sshll.u32 %s386_s17, 2  ;;  %s1584_s19 = smul.u32 3, %s386_s17 }
  0x2f   : > { %s1811_s22 = scalar_lea.vmem %s2487_s1, %s1519_s18  ;;  %s1704_s17 = smov (!%p2500_p6), 1  }
  0x30   : > { %s1816_s25 = scalar_lea.vmem %s2494_s8, %s1584_s19  ;;  %402 = sst [smem:[#allocation2]] (!%p2500_p6), %s1704_s17 }
  0x32   : > { %v1703_v0 = vmov 0.0  }
  0x33   : > { %397 = vst [vmem:[%s2495_s9] sm:$0x1] %v1703_v0  ;;  %398 = vst [vmem:[%s2496_s10] sm:$0x1] %v1703_v0 }
  0x34   : > { %399 = vst [vmem:[%s2497_s11] sm:$0x1] %v1703_v0  ;;  %400 = vst [vmem:[%s2498_s12] sm:$0x1] %v1703_v0 }
  0x35 PF: > { %s403_s18 = sld [smem:[#allocation2]] }
  0x3b   : > { %p1521_p7 = scmp.ne.s32.totalorder %s403_s18, 0 }
  0x3d   : > { %407 = sbr.rel (%p1521_p7) target bundleno = 70 (0x46), region = 60 }
  0x42   : > { %v408_v1 = vlaneseq  ;;  %v1705_v2 = vmov 0.0  }
  0x44   : > { %vm410_vm0 = vcmp.lt.s32.totalorder %v408_v1, 384 }
  0x45   : > { %412 = vst.msk [vmem:[%s1816_s25] sm:$0x7] %vm410_vm0, %v1705_v2 }
  0x46 PF: > { %s413_s19 = sld [smem:[#allocation2]] }
  0x4c   : > { %p1522_p8 = scmp.ne.s32.totalorder %s413_s19, 1 }
  0x4e   : > { %417 = sbr.rel (%p1522_p8) target bundleno = 1047 (0x417), region = 64 }
  0x53   : > { %v484_v3 = vld [vmem:[%s2488_s2 + $0x1e8] sm:$0xff]  ;;  %v486_v4 = vld [vmem:[%s2488_s2 + $0x1f8] sm:$0xff]  ;;  %v483_v5 = vld [vmem:[%s2488_s2 + $0x1e0] sm:$0xff]  ;;  %vm1708_vm1 = vmmov 0   ;;  %vm1358_vm2 = vcmask 1040384  }
  0x54   : > { %487 = vmatprep.subr.mxu0 %v484_v3  ;;  %558 = vmatprep.subr.mxu1 %v486_v4  ;;  %v485_v6 = vld [vmem:[%s2488_s2 + $0x1f0] sm:$0xff]  ;;  %v480_v7 = vld [vmem:[%s2488_s2 + $0x1c8] sm:$0xff]  ;;  %v482_v8 = vld [vmem:[%s2488_s2 + $0x1d8] sm:$0xff]  ;;  %v1706_v4 = vmov 0.0  }
  0x55   : > { %488 = vmatpush1.msra.mxu0 %v483_v5  ;;  %559 = vmatpush1.msra.mxu1 %v485_v6  ;;  %v479_v9 = vld [vmem:[%s2488_s2 + $0x1c0] sm:$0xff]  ;;  %v481_v10 = vld [vmem:[%s2488_s2 + $0x1d0] sm:$0xff]  ;;  %v476_v11 = vld [vmem:[%s2488_s2 + $0x1a8] sm:$0xff] }
  0x56   : > { %489 = vmatprep.subr.mxu0 %v480_v7  ;;  %560 = vmatprep.subr.mxu1 %v482_v8  ;;  %v478_v12 = vld [vmem:[%s2488_s2 + $0x1b8] sm:$0xff]  ;;  %v475_v13 = vld [vmem:[%s2488_s2 + $0x1a0] sm:$0xff]  ;;  %v477_v14 = vld [vmem:[%s2488_s2 + $0x1b0] sm:$0xff] }
  0x57   : > { %490 = vmatpush1.msra.mxu0 %v479_v9  ;;  %561 = vmatpush1.msra.mxu1 %v481_v10  ;;  %v472_v15 = vld [vmem:[%s2488_s2 + $0x188] sm:$0xff]  ;;  %v474_v16 = vld [vmem:[%s2488_s2 + $0x198] sm:$0xff]  ;;  %v471_v17 = vld [vmem:[%s2488_s2 + $0x180] sm:$0xff] }
  0x58   : > { %491 = vmatprep.subr.mxu0 %v476_v11  ;;  %562 = vmatprep.subr.mxu1 %v478_v12  ;;  %v473_v18 = vld [vmem:[%s2488_s2 + $0x190] sm:$0xff]  ;;  %v468_v19 = vld [vmem:[%s2488_s2 + $0x168] sm:$0xff]  ;;  %v470_v20 = vld [vmem:[%s2488_s2 + $0x178] sm:$0xff] }
  0x59   : > { %492 = vmatpush1.msra.mxu0 %v475_v13  ;;  %563 = vmatpush1.msra.mxu1 %v477_v14  ;;  %v467_v21 = vld [vmem:[%s2488_s2 + $0x160] sm:$0xff]  ;;  %v469_v22 = vld [vmem:[%s2488_s2 + $0x170] sm:$0xff]  ;;  %v464_v23 = vld [vmem:[%s2488_s2 + $0x148] sm:$0xff] }
  0x5a   : > { %493 = vmatprep.subr.mxu0 %v472_v15  ;;  %564 = vmatprep.subr.mxu1 %v474_v16  ;;  %v466_v24 = vld [vmem:[%s2488_s2 + $0x158] sm:$0xff]  ;;  %v463_v25 = vld [vmem:[%s2488_s2 + $0x140] sm:$0xff]  ;;  %v465_v26 = vld [vmem:[%s2488_s2 + $0x150] sm:$0xff] }
  0x5b   : > { %494 = vmatpush1.msra.mxu0 %v471_v17  ;;  %565 = vmatpush1.msra.mxu1 %v473_v18  ;;  %v460_v27 = vld [vmem:[%s2488_s2 + $0x128] sm:$0xff]  ;;  %v462_v28 = vld [vmem:[%s2488_s2 + $0x138] sm:$0xff]  ;;  %v459_v29 = vld [vmem:[%s2488_s2 + $0x120] sm:$0xff] }
  0x5c   : > { %495 = vmatprep.subr.mxu0 %v468_v19  ;;  %566 = vmatprep.subr.mxu1 %v470_v20  ;;  %v461_v30 = vld [vmem:[%s2488_s2 + $0x130] sm:$0xff]  ;;  %v456_v31 = vld [vmem:[%s2488_s2 + $0x108] sm:$0xff]  ;;  %v458_v32 = vld [vmem:[%s2488_s2 + $0x118] sm:$0xff] }
  0x5d   : > { %496 = vmatpush1.msra.mxu0 %v467_v21  ;;  %567 = vmatpush1.msra.mxu1 %v469_v22  ;;  %v455_v33 = vld [vmem:[%s2488_s2 + $0x100] sm:$0xff]  ;;  %v457_v34 = vld [vmem:[%s2488_s2 + $0x110] sm:$0xff]  ;;  %v452_v35 = vld [vmem:[%s2488_s2 + $0xe8] sm:$0xff] }
  0x5e   : > { %497 = vmatprep.subr.mxu0 %v464_v23  ;;  %568 = vmatprep.subr.mxu1 %v466_v24  ;;  %v454_v36 = vld [vmem:[%s2488_s2 + $0xf8] sm:$0xff]  ;;  %v451_v37 = vld [vmem:[%s2488_s2 + $0xe0] sm:$0xff]  ;;  %v453_v38 = vld [vmem:[%s2488_s2 + $0xf0] sm:$0xff] }
  0x5f   : > { %498 = vmatpush1.msra.mxu0 %v463_v25  ;;  %569 = vmatpush1.msra.mxu1 %v465_v26  ;;  %v448_v39 = vld [vmem:[%s2488_s2 + $0xc8] sm:$0xff]  ;;  %v450_v40 = vld [vmem:[%s2488_s2 + $0xd8] sm:$0xff]  ;;  %v447_v41 = vld [vmem:[%s2488_s2 + $0xc0] sm:$0xff] }
  0x60   : > { %499 = vmatprep.subr.mxu0 %v460_v27  ;;  %570 = vmatprep.subr.mxu1 %v462_v28  ;;  %v449_v42 = vld [vmem:[%s2488_s2 + $0xd0] sm:$0xff]  ;;  %v444_v43 = vld [vmem:[%s2488_s2 + $0xa8] sm:$0xff]  ;;  %v446_v44 = vld [vmem:[%s2488_s2 + $0xb8] sm:$0xff] }
  0x61   : > { %500 = vmatpush1.msra.mxu0 %v459_v29  ;;  %571 = vmatpush1.msra.mxu1 %v461_v30  ;;  %v443_v45 = vld [vmem:[%s2488_s2 + $0xa0] sm:$0xff]  ;;  %v445_v46 = vld [vmem:[%s2488_s2 + $0xb0] sm:$0xff]  ;;  %v440_v47 = vld [vmem:[%s2488_s2 + $0x88] sm:$0xff] }
  0x62   : > { %501 = vmatprep.subr.mxu0 %v456_v31  ;;  %572 = vmatprep.subr.mxu1 %v458_v32  ;;  %v442_v48 = vld [vmem:[%s2488_s2 + $0x98] sm:$0xff]  ;;  %v439_v49 = vld [vmem:[%s2488_s2 + $0x80] sm:$0xff]  ;;  %v441_v50 = vld [vmem:[%s2488_s2 + $0x90] sm:$0xff] }
  0x63   : > { %502 = vmatpush1.msra.mxu0 %v455_v33  ;;  %573 = vmatpush1.msra.mxu1 %v457_v34  ;;  %v436_v51 = vld [vmem:[%s2488_s2 + $0x68] sm:$0xff]  ;;  %v438_v52 = vld [vmem:[%s2488_s2 + $0x78] sm:$0xff]  ;;  %v435_v53 = vld [vmem:[%s2488_s2 + $0x60] sm:$0xff] }
  0x64   : > { %503 = vmatprep.subr.mxu0 %v452_v35  ;;  %574 = vmatprep.subr.mxu1 %v454_v36  ;;  %v437_v54 = vld [vmem:[%s2488_s2 + $0x70] sm:$0xff]  ;;  %v432_v55 = vld [vmem:[%s2488_s2 + $0x48] sm:$0xff]  ;;  %v434_v56 = vld [vmem:[%s2488_s2 + $0x58] sm:$0xff] }
  0x65   : > { %504 = vmatpush1.msra.mxu0 %v451_v37  ;;  %575 = vmatpush1.msra.mxu1 %v453_v38  ;;  %v431_v57 = vld [vmem:[%s2488_s2 + $0x40] sm:$0xff]  ;;  %v433_v58 = vld [vmem:[%s2488_s2 + $0x50] sm:$0xff]  ;;  %v428_v59 = vld [vmem:[%s2488_s2 + $0x28] sm:$0xff] }
  0x66   : > { %505 = vmatprep.subr.mxu0 %v448_v39  ;;  %576 = vmatprep.subr.mxu1 %v450_v40  ;;  %v430_v60 = vld [vmem:[%s2488_s2 + $0x38] sm:$0xff]  ;;  %v427_v61 = vld [vmem:[%s2488_s2 + $0x20] sm:$0xff]  ;;  %v429_v62 = vld [vmem:[%s2488_s2 + $0x30] sm:$0xff] }
  0x67   : > { %506 = vmatpush1.msra.mxu0 %v447_v41  ;;  %577 = vmatpush1.msra.mxu1 %v449_v42  ;;  %v424_v63 = vld [vmem:[%s2488_s2 + $0x8] sm:$0xff]  ;;  %v426_v0 = vld [vmem:[%s2488_s2 + $0x18] sm:$0xff]  ;;  %v423_v1 = vld [vmem:[%s2488_s2] sm:$0xff] }
  0x68   : > { %507 = vmatprep.subr.mxu0 %v444_v43  ;;  %578 = vmatprep.subr.mxu1 %v446_v44  ;;  %v425_v2 = vld [vmem:[%s2488_s2 + $0x10] sm:$0xff]  ;;  %v418_v3 = vld [vmem:[%s2495_s9] sm:$0x1]  ;;  %v815_v5 = vld [vmem:[%s2490_s4 + $0x1e8] sm:$0xff] }
  0x69   : > { %508 = vmatpush1.msra.mxu0 %v443_v45  ;;  %579 = vmatpush1.msra.mxu1 %v445_v46  ;;  %v814_v6 = vld [vmem:[%s2490_s4 + $0x1e0] sm:$0xff]  ;;  %v817_v7 = vld [vmem:[%s2490_s4 + $0x1f8] sm:$0xff]  ;;  %v811_v8 = vld [vmem:[%s2490_s4 + $0x1c8] sm:$0xff] }
  0x6a   : > { %509 = vmatprep.subr.mxu0 %v440_v47  ;;  %580 = vmatprep.subr.mxu1 %v442_v48  ;;  %v816_v9 = vld [vmem:[%s2490_s4 + $0x1f0] sm:$0xff]  ;;  %v810_v10 = vld [vmem:[%s2490_s4 + $0x1c0] sm:$0xff]  ;;  %v813_v11 = vld [vmem:[%s2490_s4 + $0x1d8] sm:$0xff] }
  0x6b   : > { %510 = vmatpush1.msra.mxu0 %v439_v49  ;;  %581 = vmatpush1.msra.mxu1 %v441_v50  ;;  %v807_v12 = vld [vmem:[%s2490_s4 + $0x1a8] sm:$0xff]  ;;  %v812_v13 = vld [vmem:[%s2490_s4 + $0x1d0] sm:$0xff]  ;;  %v806_v14 = vld [vmem:[%s2490_s4 + $0x1a0] sm:$0xff] }
  0x6c   : > { %511 = vmatprep.subr.mxu0 %v436_v51  ;;  %582 = vmatprep.subr.mxu1 %v438_v52  ;;  %v809_v15 = vld [vmem:[%s2490_s4 + $0x1b8] sm:$0xff]  ;;  %v803_v16 = vld [vmem:[%s2490_s4 + $0x188] sm:$0xff]  ;;  %v808_v17 = vld [vmem:[%s2490_s4 + $0x1b0] sm:$0xff] }
  0x6d   : > { %512 = vmatpush1.msra.mxu0 %v435_v53  ;;  %583 = vmatpush1.msra.mxu1 %v437_v54  ;;  %v802_v18 = vld [vmem:[%s2490_s4 + $0x180] sm:$0xff]  ;;  %v805_v19 = vld [vmem:[%s2490_s4 + $0x198] sm:$0xff]  ;;  %v799_v20 = vld [vmem:[%s2490_s4 + $0x168] sm:$0xff] }
  0x6e   : > { %513 = vmatprep.subr.mxu0 %v432_v55  ;;  %584 = vmatprep.subr.mxu1 %v434_v56  ;;  %v804_v21 = vld [vmem:[%s2490_s4 + $0x190] sm:$0xff]  ;;  %v798_v22 = vld [vmem:[%s2490_s4 + $0x160] sm:$0xff]  ;;  %v801_v23 = vld [vmem:[%s2490_s4 + $0x178] sm:$0xff] }
  0x6f   : > { %514 = vmatpush1.msra.mxu0 %v431_v57  ;;  %585 = vmatpush1.msra.mxu1 %v433_v58  ;;  %v795_v24 = vld [vmem:[%s2490_s4 + $0x148] sm:$0xff]  ;;  %v800_v25 = vld [vmem:[%s2490_s4 + $0x170] sm:$0xff]  ;;  %v794_v26 = vld [vmem:[%s2490_s4 + $0x140] sm:$0xff] }
  0x70   : > { %515 = vmatprep.subr.mxu0 %v428_v59  ;;  %586 = vmatprep.subr.mxu1 %v430_v60  ;;  %v797_v27 = vld [vmem:[%s2490_s4 + $0x158] sm:$0xff]  ;;  %v791_v28 = vld [vmem:[%s2490_s4 + $0x128] sm:$0xff]  ;;  %v796_v29 = vld [vmem:[%s2490_s4 + $0x150] sm:$0xff] }
  0x71   : > { %516 = vmatpush1.msra.mxu0 %v427_v61  ;;  %587 = vmatpush1.msra.mxu1 %v429_v62  ;;  %v790_v30 = vld [vmem:[%s2490_s4 + $0x120] sm:$0xff]  ;;  %v793_v31 = vld [vmem:[%s2490_s4 + $0x138] sm:$0xff]  ;;  %v787_v32 = vld [vmem:[%s2490_s4 + $0x108] sm:$0xff] }
  0x72   : > { %517 = vmatprep.subr.mxu0 %v424_v63  ;;  %588 = vmatprep.subr.mxu1 %v426_v0  ;;  %v792_v33 = vld [vmem:[%s2490_s4 + $0x130] sm:$0xff]  ;;  %v786_v34 = vld [vmem:[%s2490_s4 + $0x100] sm:$0xff]  ;;  %v789_v35 = vld [vmem:[%s2490_s4 + $0x118] sm:$0xff] }
  0x73   : > { %518 = vmatpush1.msra.mxu0 %v423_v1  ;;  %551 = vmatprep.mubr.f32.mxu0 %v1706_v4  ;;  %v783_v36 = vld [vmem:[%s2490_s4 + $0xe8] sm:$0xff]  ;;  %v788_v37 = vld [vmem:[%s2490_s4 + $0x110] sm:$0xff]  ;;  %v782_v38 = vld [vmem:[%s2490_s4 + $0xe0] sm:$0xff] }
  0x74   : > { %589 = vmatpush1.msra.mxu1 %v425_v2  ;;  %622 = vmatprep.mubr.f32.mxu1 %v1706_v4  ;;  %v785_v39 = vld [vmem:[%s2490_s4 + $0xf8] sm:$0xff]  ;;  %v779_v40 = vld [vmem:[%s2490_s4 + $0xc8] sm:$0xff]  ;;  %v784_v41 = vld [vmem:[%s2490_s4 + $0xf0] sm:$0xff] }
  0x75   : > { %552 = vmatmul.mubr.f32.vlgmr.msra.gmra.mxu0 %v418_v3  ;;  %623 = vmatmul.mubr.f32.vlgmr.msra.gmra.mxu1 %v418_v3  ;;  %v778_v42 = vld [vmem:[%s2490_s4 + $0xc0] sm:$0xff]  ;;  %v781_v43 = vld [vmem:[%s2490_s4 + $0xd8] sm:$0xff]  ;;  %v775_v44 = vld [vmem:[%s2490_s4 + $0xa8] sm:$0xff] }
  0x76   : > { %882 = vmatprep.mubr.f32.mxu0 %v1706_v4  ;;  %953 = vmatprep.mubr.f32.mxu1 %v1706_v4  ;;  %v780_v45 = vld [vmem:[%s2490_s4 + $0xd0] sm:$0xff]  ;;  %v774_v46 = vld [vmem:[%s2490_s4 + $0xa0] sm:$0xff]  ;;  %v777_v47 = vld [vmem:[%s2490_s4 + $0xb8] sm:$0xff] }
  0x77   : > { %818 = vmatprep.subr.mxu0 %v815_v5  ;;  %889 = vmatprep.subr.mxu1 %v817_v7  ;;  %v771_v48 = vld [vmem:[%s2490_s4 + $0x88] sm:$0xff]  ;;  %v776_v49 = vld [vmem:[%s2490_s4 + $0xb0] sm:$0xff]  ;;  %v770_v50 = vld [vmem:[%s2490_s4 + $0x80] sm:$0xff] }
  0x78   : > { %819 = vmatpush1.msra.mxu0 %v814_v6  ;;  %890 = vmatpush1.msra.mxu1 %v816_v9  ;;  %v773_v51 = vld [vmem:[%s2490_s4 + $0x98] sm:$0xff]  ;;  %v767_v52 = vld [vmem:[%s2490_s4 + $0x68] sm:$0xff]  ;;  %v772_v53 = vld [vmem:[%s2490_s4 + $0x90] sm:$0xff] }
  0x79   : > { %820 = vmatprep.subr.mxu0 %v811_v8  ;;  %891 = vmatprep.subr.mxu1 %v813_v11  ;;  %v766_v54 = vld [vmem:[%s2490_s4 + $0x60] sm:$0xff]  ;;  %v769_v55 = vld [vmem:[%s2490_s4 + $0x78] sm:$0xff]  ;;  %v763_v56 = vld [vmem:[%s2490_s4 + $0x48] sm:$0xff] }
  0x7a   : > { %821 = vmatpush1.msra.mxu0 %v810_v10  ;;  %892 = vmatpush1.msra.mxu1 %v812_v13  ;;  %v768_v57 = vld [vmem:[%s2490_s4 + $0x70] sm:$0xff]  ;;  %v762_v58 = vld [vmem:[%s2490_s4 + $0x40] sm:$0xff]  ;;  %v765_v59 = vld [vmem:[%s2490_s4 + $0x58] sm:$0xff] }
  0x7b   : > { %822 = vmatprep.subr.mxu0 %v807_v12  ;;  %893 = vmatprep.subr.mxu1 %v809_v15  ;;  %v759_v60 = vld [vmem:[%s2490_s4 + $0x28] sm:$0xff]  ;;  %v764_v61 = vld [vmem:[%s2490_s4 + $0x50] sm:$0xff]  ;;  %v758_v62 = vld [vmem:[%s2490_s4 + $0x20] sm:$0xff] }
  0x7c   : > { %823 = vmatpush1.msra.mxu0 %v806_v14  ;;  %894 = vmatpush1.msra.mxu1 %v808_v17  ;;  %v761_v63 = vld [vmem:[%s2490_s4 + $0x38] sm:$0xff]  ;;  %v755_v0 = vld [vmem:[%s2490_s4 + $0x8] sm:$0xff]  ;;  %v760_v1 = vld [vmem:[%s2490_s4 + $0x30] sm:$0xff] }
  0x7d   : > { %824 = vmatprep.subr.mxu0 %v803_v16  ;;  %895 = vmatprep.subr.mxu1 %v805_v19  ;;  %v754_v2 = vld [vmem:[%s2490_s4] sm:$0xff]  ;;  %v757_v3 = vld [vmem:[%s2490_s4 + $0x18] sm:$0xff]  ;;  %v756_v6 = vld [vmem:[%s2490_s4 + $0x10] sm:$0xff] }
  0x7e   : > { %825 = vmatpush1.msra.mxu0 %v802_v18  ;;  %896 = vmatpush1.msra.mxu1 %v804_v21  ;;  %v420_v5 = vld [vmem:[%s2497_s11] sm:$0x1]  ;;  %v751_v7 = vld [vmem:[%s2489_s3 + $0x1e8] sm:$0xff]  ;;  %v753_v8 = vld [vmem:[%s2489_s3 + $0x1f8] sm:$0xff] }
  0x7f   : > { %826 = vmatprep.subr.mxu0 %v799_v20  ;;  %897 = vmatprep.subr.mxu1 %v801_v23  ;;  %v750_v9 = vld [vmem:[%s2489_s3 + $0x1e0] sm:$0xff]  ;;  %v752_v10 = vld [vmem:[%s2489_s3 + $0x1f0] sm:$0xff]  ;;  %v747_v11 = vld [vmem:[%s2489_s3 + $0x1c8] sm:$0xff] }
  0x80   : > { %827 = vmatpush1.msra.mxu0 %v798_v22  ;;  %898 = vmatpush1.msra.mxu1 %v800_v25  ;;  %v749_v12 = vld [vmem:[%s2489_s3 + $0x1d8] sm:$0xff]  ;;  %v746_v13 = vld [vmem:[%s2489_s3 + $0x1c0] sm:$0xff]  ;;  %v748_v14 = vld [vmem:[%s2489_s3 + $0x1d0] sm:$0xff] }
  0x81   : > { %828 = vmatprep.subr.mxu0 %v795_v24  ;;  %899 = vmatprep.subr.mxu1 %v797_v27  ;;  %v743_v15 = vld [vmem:[%s2489_s3 + $0x1a8] sm:$0xff]  ;;  %v745_v16 = vld [vmem:[%s2489_s3 + $0x1b8] sm:$0xff]  ;;  %v742_v17 = vld [vmem:[%s2489_s3 + $0x1a0] sm:$0xff] }
  0x82   : > { %829 = vmatpush1.msra.mxu0 %v794_v26  ;;  %900 = vmatpush1.msra.mxu1 %v796_v29  ;;  %v744_v18 = vld [vmem:[%s2489_s3 + $0x1b0] sm:$0xff]  ;;  %v739_v19 = vld [vmem:[%s2489_s3 + $0x188] sm:$0xff]  ;;  %v741_v20 = vld [vmem:[%s2489_s3 + $0x198] sm:$0xff] }
  0x83   : > { %830 = vmatprep.subr.mxu0 %v791_v28  ;;  %901 = vmatprep.subr.mxu1 %v793_v31  ;;  %v738_v21 = vld [vmem:[%s2489_s3 + $0x180] sm:$0xff]  ;;  %v740_v22 = vld [vmem:[%s2489_s3 + $0x190] sm:$0xff]  ;;  %v735_v23 = vld [vmem:[%s2489_s3 + $0x168] sm:$0xff] }
  0x84   : > { %831 = vmatpush1.msra.mxu0 %v790_v30  ;;  %902 = vmatpush1.msra.mxu1 %v792_v33  ;;  %v737_v24 = vld [vmem:[%s2489_s3 + $0x178] sm:$0xff]  ;;  %v734_v25 = vld [vmem:[%s2489_s3 + $0x160] sm:$0xff]  ;;  %v736_v26 = vld [vmem:[%s2489_s3 + $0x170] sm:$0xff] }
  0x85   : > { %832 = vmatprep.subr.mxu0 %v787_v32  ;;  %903 = vmatprep.subr.mxu1 %v789_v35  ;;  %v731_v27 = vld [vmem:[%s2489_s3 + $0x148] sm:$0xff]  ;;  %v733_v28 = vld [vmem:[%s2489_s3 + $0x158] sm:$0xff]  ;;  %v730_v29 = vld [vmem:[%s2489_s3 + $0x140] sm:$0xff] }
  0x86   : > { %833 = vmatpush1.msra.mxu0 %v786_v34  ;;  %904 = vmatpush1.msra.mxu1 %v788_v37  ;;  %v732_v30 = vld [vmem:[%s2489_s3 + $0x150] sm:$0xff]  ;;  %v727_v31 = vld [vmem:[%s2489_s3 + $0x128] sm:$0xff]  ;;  %v729_v32 = vld [vmem:[%s2489_s3 + $0x138] sm:$0xff] }
  0x87   : > { %834 = vmatprep.subr.mxu0 %v783_v36  ;;  %905 = vmatprep.subr.mxu1 %v785_v39  ;;  %v726_v33 = vld [vmem:[%s2489_s3 + $0x120] sm:$0xff]  ;;  %v728_v34 = vld [vmem:[%s2489_s3 + $0x130] sm:$0xff]  ;;  %v723_v35 = vld [vmem:[%s2489_s3 + $0x108] sm:$0xff] }
  0x88   : > { %835 = vmatpush1.msra.mxu0 %v782_v38  ;;  %906 = vmatpush1.msra.mxu1 %v784_v41  ;;  %v725_v36 = vld [vmem:[%s2489_s3 + $0x118] sm:$0xff]  ;;  %v722_v37 = vld [vmem:[%s2489_s3 + $0x100] sm:$0xff]  ;;  %v724_v38 = vld [vmem:[%s2489_s3 + $0x110] sm:$0xff] }
  0x89   : > { %836 = vmatprep.subr.mxu0 %v779_v40  ;;  %907 = vmatprep.subr.mxu1 %v781_v43  ;;  %v719_v39 = vld [vmem:[%s2489_s3 + $0xe8] sm:$0xff]  ;;  %v721_v40 = vld [vmem:[%s2489_s3 + $0xf8] sm:$0xff]  ;;  %v718_v41 = vld [vmem:[%s2489_s3 + $0xe0] sm:$0xff] }
  0x8a   : > { %837 = vmatpush1.msra.mxu0 %v778_v42  ;;  %908 = vmatpush1.msra.mxu1 %v780_v45  ;;  %v720_v42 = vld [vmem:[%s2489_s3 + $0xf0] sm:$0xff]  ;;  %v715_v43 = vld [vmem:[%s2489_s3 + $0xc8] sm:$0xff]  ;;  %v714_v45 = vld [vmem:[%s2489_s3 + $0xc0] sm:$0xff] }
  0x8b   : > { %838 = vmatprep.subr.mxu0 %v775_v44  ;;  %909 = vmatprep.subr.mxu1 %v777_v47  ;;  %v717_v44 = vld [vmem:[%s2489_s3 + $0xd8] sm:$0xff]  ;;  %v711_v47 = vld [vmem:[%s2489_s3 + $0xa8] sm:$0xff] }
  0x8c   : > { %839 = vmatpush1.msra.mxu0 %v774_v46  ;;  %910 = vmatpush1.msra.mxu1 %v776_v49  ;;  %v716_v46 = vld [vmem:[%s2489_s3 + $0xd0] sm:$0xff]  ;;  %v710_v49 = vld [vmem:[%s2489_s3 + $0xa0] sm:$0xff] }
  0x8d   : > { %840 = vmatprep.subr.mxu0 %v771_v48  ;;  %911 = vmatprep.subr.mxu1 %v773_v51  ;;  %v713_v48 = vld [vmem:[%s2489_s3 + $0xb8] sm:$0xff]  ;;  %v707_v51 = vld [vmem:[%s2489_s3 + $0x88] sm:$0xff] }
  0x8e   : > { %841 = vmatpush1.msra.mxu0 %v770_v50  ;;  %912 = vmatpush1.msra.mxu1 %v772_v53  ;;  %v712_v50 = vld [vmem:[%s2489_s3 + $0xb0] sm:$0xff]  ;;  %v706_v53 = vld [vmem:[%s2489_s3 + $0x80] sm:$0xff] }
  0x8f   : > { %842 = vmatprep.subr.mxu0 %v767_v52  ;;  %913 = vmatprep.subr.mxu1 %v769_v55  ;;  %v709_v52 = vld [vmem:[%s2489_s3 + $0x98] sm:$0xff]  ;;  %v703_v55 = vld [vmem:[%s2489_s3 + $0x68] sm:$0xff] }
  0x90   : > { %843 = vmatpush1.msra.mxu0 %v766_v54  ;;  %914 = vmatpush1.msra.mxu1 %v768_v57  ;;  %v708_v54 = vld [vmem:[%s2489_s3 + $0x90] sm:$0xff]  ;;  %v702_v57 = vld [vmem:[%s2489_s3 + $0x60] sm:$0xff] }
  0x91   : > { %844 = vmatprep.subr.mxu0 %v763_v56  ;;  %915 = vmatprep.subr.mxu1 %v765_v59  ;;  %v705_v56 = vld [vmem:[%s2489_s3 + $0x78] sm:$0xff]  ;;  %v699_v59 = vld [vmem:[%s2489_s3 + $0x48] sm:$0xff] }
  0x92   : > { %845 = vmatpush1.msra.mxu0 %v762_v58  ;;  %916 = vmatpush1.msra.mxu1 %v764_v61  ;;  %v704_v58 = vld [vmem:[%s2489_s3 + $0x70] sm:$0xff]  ;;  %v698_v61 = vld [vmem:[%s2489_s3 + $0x40] sm:$0xff] }
  0x93   : > { %846 = vmatprep.subr.mxu0 %v759_v60  ;;  %917 = vmatprep.subr.mxu1 %v761_v63  ;;  %v701_v60 = vld [vmem:[%s2489_s3 + $0x58] sm:$0xff]  ;;  %v695_v63 = vld [vmem:[%s2489_s3 + $0x28] sm:$0xff] }
  0x94   : > { %847 = vmatpush1.msra.mxu0 %v758_v62  ;;  %918 = vmatpush1.msra.mxu1 %v760_v1  ;;  %v700_v62 = vld [vmem:[%s2489_s3 + $0x50] sm:$0xff]  ;;  %v694_v1 = vld [vmem:[%s2489_s3 + $0x20] sm:$0xff] }
  0x95   : > { %848 = vmatprep.subr.mxu0 %v755_v0  ;;  %919 = vmatprep.subr.mxu1 %v757_v3  ;;  %v697_v0 = vld [vmem:[%s2489_s3 + $0x38] sm:$0xff]  ;;  %v691_v3 = vld [vmem:[%s2489_s3 + $0x8] sm:$0xff] }
  0x96   : > { %849 = vmatpush1.msra.mxu0 %v754_v2  ;;  %920 = vmatpush1.msra.mxu1 %v756_v6  ;;  %v696_v2 = vld [vmem:[%s2489_s3 + $0x30] sm:$0xff]  ;;  %v690_v6 = vld [vmem:[%s2489_s3] sm:$0xff] }
  0x97   : > { %883 = vmatmul.mubr.f32.vlgmr.msra.gmra.mxu0 %v420_v5  ;;  %960 = vmatprep.subr.mxu0 %v751_v7  ;;  %v692_v7 = vld [vmem:[%s2489_s3 + $0x10] sm:$0xff] }
  0x98   : > { %1031 = vmatprep.subr.mxu1 %v753_v8  ;;  %954 = vmatmul.mubr.f32.vlgmr.msra.gmra.mxu1 %v420_v5  ;;  %v693_v5 = vld [vmem:[%s2489_s3 + $0x18] sm:$0xff]  ;;  %v1707_v8 = vmov 1966171168  }
  0x99   : > { %961 = vmatpush1.msra.mxu0 %v750_v9  ;;  %1032 = vmatpush1.msra.mxu1 %v752_v10  ;;  %v636_v9 = vunpack.c.l.s4 %v1707_v8  ;;  %v638_v10 = vlaneseq  ;;  %v1178_v8 = vld [vmem:[#allocation5 + $0xd0] sm:$0xff] }
  0x9a   : > { %962 = vmatprep.subr.mxu0 %v747_v11  ;;  %1033 = vmatprep.subr.mxu1 %v749_v12 }
  0x9b   : > { %963 = vmatpush1.msra.mxu0 %v746_v13  ;;  %1034 = vmatpush1.msra.mxu1 %v748_v14  ;;  %v637_v11 = vunpack.c.0.s8 %v636_v9  ;;  %v2423_v12 = vshrl.u32 %v638_v10, 7  ;;  %v1174_v9 = vld [vmem:[#allocation5 + $0xb0] sm:$0xff]  ;;  %vm1416_vm4 = vcmp.lt.s32.totalorder %v638_v10, 384 }
  0x9c   : > { %964 = vmatprep.subr.mxu0 %v743_v15  ;;  %1035 = vmatprep.subr.mxu1 %v745_v16 }
  0x9d   : > { %965 = vmatpush1.msra.mxu0 %v742_v17  ;;  %1036 = vmatpush1.msra.mxu1 %v744_v18  ;;  %v2426_v15 = vsub.s32 %v637_v11, %v2423_v12  ;;  %v1173_v11 = vld [vmem:[#allocation5 + $0xa8] sm:$0xff] }
  0x9e   : > { %966 = vmatprep.subr.mxu0 %v739_v19  ;;  %1037 = vmatprep.subr.mxu1 %v741_v20 }
  0x9f   : > { %967 = vmatpush1.msra.mxu0 %v738_v21  ;;  %1038 = vmatpush1.msra.mxu1 %v740_v22 }
  0xa0   : > { %968 = vmatprep.subr.mxu0 %v735_v23  ;;  %1039 = vmatprep.subr.mxu1 %v737_v24  ;;  %v422_v23 = vld [vmem:[%s1811_s22] sm:$0xf]  ;;  %s1374_s22 = sld [smem:[#allocation4 + %s1783_s0]] }
  0xa1   : > { %969 = vmatpush1.msra.mxu0 %v734_v25  ;;  %1040 = vmatpush1.msra.mxu1 %v736_v26 }
  0xa2   : > { %970 = vmatprep.subr.mxu0 %v731_v27  ;;  %1041 = vmatprep.subr.mxu1 %v733_v28 }
  0xa3   : > { %971 = vmatpush1.msra.mxu0 %v730_v29  ;;  %1042 = vmatpush1.msra.mxu1 %v732_v30 }
  0xa4   : > { %972 = vmatprep.subr.mxu0 %v727_v31  ;;  %1043 = vmatprep.subr.mxu1 %v729_v32 }
  0xa5   : > { %973 = vmatpush1.msra.mxu0 %v726_v33  ;;  %1044 = vmatpush1.msra.mxu1 %v728_v34 }
  0xa6   : > { %974 = vmatprep.subr.mxu0 %v723_v35  ;;  %1045 = vmatprep.subr.mxu1 %v725_v36  ;;  %p1375_p9 = scmp.eq.s32.totalorder %s1374_s22, 1 }
  0xa7   : > { %975 = vmatpush1.msra.mxu0 %v722_v37  ;;  %1046 = vmatpush1.msra.mxu1 %v724_v38  ;;  %v419_v38 = vld [vmem:[%s2496_s10] sm:$0x1] }
  0xa8   : > { %976 = vmatprep.subr.mxu0 %v719_v39  ;;  %1047 = vmatprep.subr.mxu1 %v721_v40 }
  0xa9   : > { %977 = vmatpush1.msra.mxu0 %v718_v41  ;;  %1048 = vmatpush1.msra.mxu1 %v720_v42 }
  0xaa   : > { %978 = vmatprep.subr.mxu0 %v715_v43  ;;  %1049 = vmatprep.subr.mxu1 %v717_v44 }
  0xab   : > { %979 = vmatpush1.msra.mxu0 %v714_v45  ;;  %1050 = vmatpush1.msra.mxu1 %v716_v46 }
  0xac   : > { %980 = vmatprep.subr.mxu0 %v711_v47  ;;  %1051 = vmatprep.subr.mxu1 %v713_v48  ;;  %v1198_v48 = vld [vmem:[#allocation5 + $0x170] sm:$0xff] }
  0xad   : > { %981 = vmatpush1.msra.mxu0 %v710_v49  ;;  %1052 = vmatpush1.msra.mxu1 %v712_v50  ;;  %v1197_v49 = vld [vmem:[#allocation5 + $0x168] sm:$0xff]  ;;  %v1199_v50 = vld [vmem:[#allocation5 + $0x178] sm:$0xff] }
  0xae   : > { %982 = vmatprep.subr.mxu0 %v707_v51  ;;  %1053 = vmatprep.subr.mxu1 %v709_v52  ;;  %v1195_v51 = vld [vmem:[#allocation5 + $0x158] sm:$0xff]  ;;  %v1194_v52 = vld [vmem:[#allocation5 + $0x150] sm:$0xff] }
  0xaf   : > { %983 = vmatpush1.msra.mxu0 %v706_v53  ;;  %1054 = vmatpush1.msra.mxu1 %v708_v54  ;;  %v1196_v53 = vld [vmem:[#allocation5 + $0x160] sm:$0xff] }
  0xb0   : > { %984 = vmatprep.subr.mxu0 %v703_v55  ;;  %1055 = vmatprep.subr.mxu1 %v705_v56  ;;  %v1192_v54 = vld [vmem:[#allocation5 + $0x140] sm:$0xff]  ;;  %v1191_v55 = vld [vmem:[#allocation5 + $0x138] sm:$0xff]  ;;  %v1193_v56 = vld [vmem:[#allocation5 + $0x148] sm:$0xff] }
  0xb1   : > { %985 = vmatpush1.msra.mxu0 %v702_v57  ;;  %1056 = vmatpush1.msra.mxu1 %v704_v58  ;;  %v1189_v57 = vld [vmem:[#allocation5 + $0x128] sm:$0xff]  ;;  %v1188_v58 = vld [vmem:[#allocation5 + $0x120] sm:$0xff] }
  0xb2   : > { %986 = vmatprep.subr.mxu0 %v699_v59  ;;  %1057 = vmatprep.subr.mxu1 %v701_v60  ;;  %v1190_v59 = vld [vmem:[#allocation5 + $0x130] sm:$0xff] }
  0xb3   : > { %987 = vmatpush1.msra.mxu0 %v698_v61  ;;  %1058 = vmatpush1.msra.mxu1 %v700_v62  ;;  %v1186_v60 = vld [vmem:[#allocation5 + $0x110] sm:$0xff]  ;;  %v1185_v61 = vld [vmem:[#allocation5 + $0x108] sm:$0xff]  ;;  %v1187_v62 = vld [vmem:[#allocation5 + $0x118] sm:$0xff] }
  0xb4   : > { %988 = vmatprep.subr.mxu0 %v695_v63  ;;  %1059 = vmatprep.subr.mxu1 %v697_v0  ;;  %v1183_v63 = vld [vmem:[#allocation5 + $0xf8] sm:$0xff]  ;;  %v1182_v0 = vld [vmem:[#allocation5 + $0xf0] sm:$0xff] }
  0xb5   : > { %989 = vmatpush1.msra.mxu0 %v694_v1  ;;  %1060 = vmatpush1.msra.mxu1 %v696_v2  ;;  %v1184_v1 = vld [vmem:[#allocation5 + $0x100] sm:$0xff] }
  0xb6   : > { %990 = vmatprep.subr.mxu0 %v691_v3  ;;  %1061 = vmatprep.subr.mxu1 %v693_v5  ;;  %v1180_v2 = vld [vmem:[#allocation5 + $0xe0] sm:$0xff]  ;;  %v1179_v3 = vld [vmem:[#allocation5 + $0xd8] sm:$0xff]  ;;  %v1181_v5 = vld [vmem:[#allocation5 + $0xe8] sm:$0xff] }
  0xb7   : > { %991 = vmatpush1.msra.mxu0 %v690_v6  ;;  %1024 = vmatprep.mubr.f32.mxu0 %v1706_v4  ;;  %v1177_v6 = vld [vmem:[#allocation5 + $0xc8] sm:$0xff] }
  0xb8   : > { %1062 = vmatpush1.msra.mxu1 %v692_v7  ;;  %1095 = vmatprep.mubr.f32.mxu1 %v1706_v4  ;;  %v1176_v7 = vld [vmem:[#allocation5 + $0xc0] sm:$0xff] }
  0xb9   : > { %1549 = vmatprep.subr.mxu1 %v1706_v4  ;;  %1217 = vmatprep.subr.mxu0 %v1198_v48 }
 0x135   : > { %v553_v13 = vpop.f32.mrf.mxu0  ;;  %v624_v14 = vpop.f32.mrf.mxu1 }
 0x137   : > { %v555_v16 = vpop.f32.mrf.mxu0  ;;  %v626_v17 = vpop.f32.mrf.mxu1 }
 0x138   : > { %v633_v18 = vcombine.low %v553_v13, %v555_v16  ;;  %v634_v19 = vcombine.low %v624_v14, %v626_v17  ;;  %v1175_v13 = vld [vmem:[#allocation5 + $0xb8] sm:$0xff]  ;;  %v1170_v16 = vld [vmem:[#allocation5 + $0x90] sm:$0xff]  ;;  %v1172_v17 = vld [vmem:[#allocation5 + $0xa0] sm:$0xff] }
 0x139   : > { %v1171_v14 = vld [vmem:[#allocation5 + $0x98] sm:$0xff] }
 0x13a   : > { %v641_v20 = vrot.slane %v633_v18, %v2426_v15  ;;  %v648_v21 = vrot.slane %v634_v19, %v2426_v15  ;;  %v1168_v18 = vld [vmem:[#allocation5 + $0x80] sm:$0xff]  ;;  %v1167_v19 = vld [vmem:[#allocation5 + $0x78] sm:$0xff] }
 0x13c   : > { %v649_v22 = vcombine.low %v641_v20, %v648_v21  ;;  %v1169_v20 = vld [vmem:[#allocation5 + $0x88] sm:$0xff] }
 0x13d   : > { %v1165_v21 = vld [vmem:[#allocation5 + $0x68] sm:$0xff] }
 0x13e   : > { %v656_v24 = vrot.slane %v649_v22, %v2426_v15  ;;  %v1164_v22 = vld [vmem:[#allocation5 + $0x60] sm:$0xff] }
 0x140   : > { %v658_v25 = vadd.f32 %v656_v24, %v422_v23  ;;  %v1166_v23 = vld [vmem:[#allocation5 + $0x70] sm:$0xff] }
 0x141   : > { %v1162_v24 = vld [vmem:[#allocation5 + $0x50] sm:$0xff] }
 0x142   : > { %v1523_v26 = vmul.f32 -1.442695, %v658_v25  ;;  %v666_v27 = vrot.slane %v658_v25, 1  ;;  %v677_v29 = vrot.slane %v658_v25, 3  ;;  %v674_v32 = vrot.slane %v658_v25, 2  ;;  %v1161_v25 = vld [vmem:[#allocation5 + $0x48] sm:$0xff] }
 0x144   : > { %1615 = vpow2.f32 %v1523_v26  ;;  %v1524_v28 = vmul.f32 -1.442695, %v666_v27  ;;  %v1525_v30 = vmul.f32 -1.442695, %v677_v29  ;;  %v1163_v26 = vld [vmem:[#allocation5 + $0x58] sm:$0xff]  ;;  %v1160_v29 = vld [vmem:[#allocation5 + $0x40] sm:$0xff] }
 0x145   : > { %v1159_v27 = vld [vmem:[#allocation5 + $0x38] sm:$0xff] }
 0x146   : > { %1617 = vpow2.f32 %v1524_v28  ;;  %v1158_v28 = vld [vmem:[#allocation5 + $0x30] sm:$0xff] }
 0x147   : > { %1619 = vpow2.f32 %v1525_v30  ;;  %v1156_v30 = vld [vmem:[#allocation5 + $0x20] sm:$0xff] }
 0x151   : > { %v1616_v31 = vpop.eup %1615 }
 0x152   : > { %v662_v33 = vadd.f32 1.0, %v1616_v31  ;;  %v1155_v31 = vld [vmem:[#allocation5 + $0x18] sm:$0xff] }
 0x153   : > { %v1618_v34 = vpop.eup %1617 }
 0x154   : > { %1621 = vrcp.f32 %v662_v33  ;;  %v671_v35 = vadd.f32 1.0, %v1618_v34  ;;  %v1620_v36 = vpop.eup %1619  ;;  %v1153_v33 = vld [vmem:[#allocation5 + $0x8] sm:$0xff]  ;;  %v1152_v34 = vld [vmem:[#allocation5] sm:$0xff] }
 0x155   : > { %1623 = vtanh.f32 %v674_v32  ;;  %v682_v41 = vadd.f32 1.0, %v1620_v36  ;;  %v1157_v32 = vld [vmem:[#allocation5 + $0x28] sm:$0xff] }
 0x156   : > { %1625 = vrcp.f32 %v671_v35  ;;  %v1154_v35 = vld [vmem:[#allocation5 + $0x10] sm:$0xff] }
 0x157   : > { %1627 = vrcp.f32 %v682_v41  ;;  %v884_v36 = vpop.f32.mrf.mxu0 }
 0x159   : > { %v886_v41 = vpop.f32.mrf.mxu0 }
 0x161   : > { %v1622_v37 = vpop.eup %1621 }
 0x162   : > { %v1624_v39 = vpop.eup %1623 }
 0x163   : > { %v1626_v40 = vpop.eup %1625  ;;  %v686_v43 = vmul.f32 %v1624_v39, %v1622_v37  ;;  %v1106_v37 = vsub.s32 0, %v2423_v12  ;;  %v955_v39 = vpop.f32.mrf.mxu1 }
 0x164   : > { %v685_v42 = vmul.f32 %v1626_v40, %v419_v38  ;;  %v1628_v45 = vpop.eup %1627  ;;  %v1102_v38 = vld [vmem:[%s2491_s5] sm:$0xf]  ;;  %v1110_v40 = vsub.s32 1, %v2423_v12 }
 0x166   : > { %v687_v44 = vadd.f32 %v686_v43, %v685_v42  ;;  %v1107_v42 = vrot.slane %v1102_v38, %v1106_v37 }
 0x168   : > { %1629 = vtanh.f32 %v687_v44  ;;  %1378 = vst [vmem:[%s2496_s10] sm:$0x1] %v687_v44  ;;  %v957_v44 = vpop.f32.mrf.mxu1 }
 0x175   : > { %v1630_v46 = vpop.eup %1629 }
 0x176   : > { %v689_v47 = vmul.f32 %v1630_v46, %v1628_v45  ;;  %v1111_v46 = vrot.slane %v1102_v38, %v1110_v40 }
 0x178   : > { %1025 = vmatmul.mubr.f32.vlgmr.msra.gmra.mxu0 %v689_v47  ;;  %1377 = vst [vmem:[%s2495_s9] sm:$0x1] %v689_v47  ;;  %1096 = vmatmul.mubr.f32.vlgmr.msra.gmra.mxu1 %v689_v47 }
 0x179   : > { %1281 = vmatprep.mubr.f32.mxu0 %v1706_v4  ;;  %1218 = vmatpush1.msra.mxu0 %v1197_v49 }
 0x17a   : > { %1550 = vmatpush3.msra.mxu1 %v1199_v50  ;;  %1219 = vmatprep.subr.mxu0 %v1195_v51 }
 0x17b   : > { %1551 = vmatprep.subr.mxu1 %v1706_v4  ;;  %1220 = vmatpush1.msra.mxu0 %v1194_v52  ;;  %v1118_v52 = vsub.s32 3, %v2423_v12 }
 0x17c   : > { %1552 = vmatpush3.msra.mxu1 %v1196_v53  ;;  %1221 = vmatprep.subr.mxu0 %v1192_v54 }
 0x17d   : > { %1553 = vmatprep.subr.mxu1 %v1706_v4  ;;  %1222 = vmatpush1.msra.mxu0 %v1191_v55 }
 0x17e   : > { %1554 = vmatpush3.msra.mxu1 %v1193_v56  ;;  %1223 = vmatprep.subr.mxu0 %v1189_v57  ;;  %v1119_v56 = vrot.slane %v1102_v38, %v1118_v52  ;;  %v1114_v57 = vsub.s32 2, %v2423_v12 }
 0x17f   : > { %1555 = vmatprep.subr.mxu1 %v1706_v4  ;;  %1224 = vmatpush1.msra.mxu0 %v1188_v58 }
 0x180   : > { %1556 = vmatpush3.msra.mxu1 %v1190_v59  ;;  %1225 = vmatprep.subr.mxu0 %v1186_v60  ;;  %v1115_v60 = vrot.slane %v1102_v38, %v1114_v57 }
 0x181   : > { %1557 = vmatprep.subr.mxu1 %v1706_v4  ;;  %1226 = vmatpush1.msra.mxu0 %v1185_v61 }
 0x182   : > { %1558 = vmatpush3.msra.mxu1 %v1187_v62  ;;  %1227 = vmatprep.subr.mxu0 %v1183_v63 }
 0x183   : > { %1559 = vmatprep.subr.mxu1 %v1706_v4  ;;  %1228 = vmatpush1.msra.mxu0 %v1182_v0 }
 0x184   : > { %1560 = vmatpush3.msra.mxu1 %v1184_v1  ;;  %1229 = vmatprep.subr.mxu0 %v1180_v2 }
 0x185   : > { %1561 = vmatprep.subr.mxu1 %v1706_v4  ;;  %1230 = vmatpush1.msra.mxu0 %v1179_v3 }
 0x186   : > { %1562 = vmatpush3.msra.mxu1 %v1181_v5  ;;  %1231 = vmatprep.subr.mxu0 %v1177_v6  ;;  %v421_v6 = vld [vmem:[%s2498_s12] sm:$0x1] }
 0x187   : > { %1563 = vmatprep.subr.mxu1 %v1706_v4  ;;  %1232 = vmatpush1.msra.mxu0 %v1176_v7 }
 0x188   : > { %1564 = vmatpush3.msra.mxu1 %v1178_v8  ;;  %1233 = vmatprep.subr.mxu0 %v1174_v9 }
 0x189   : > { %1565 = vmatprep.subr.mxu1 %v1706_v4  ;;  %1234 = vmatpush1.msra.mxu0 %v1173_v11 }
 0x18a   : > { %1566 = vmatpush3.msra.mxu1 %v1175_v13  ;;  %1235 = vmatprep.subr.mxu0 %v1171_v14 }
 0x18b   : > { %1567 = vmatprep.subr.mxu1 %v1706_v4  ;;  %1236 = vmatpush1.msra.mxu0 %v1170_v16 }
 0x18c   : > { %1568 = vmatpush3.msra.mxu1 %v1172_v17  ;;  %1237 = vmatprep.subr.mxu0 %v1168_v18  ;;  %v1200_v18 = vld [vmem:[%s2493_s7] sm:$0x7] }
 0x18d   : > { %1569 = vmatprep.subr.mxu1 %v1706_v4  ;;  %1238 = vmatpush1.msra.mxu0 %v1167_v19  ;;  %v1205_v19 = vrot.slane %v1200_v18, %v1106_v37 }
 0x18e   : > { %1570 = vmatpush3.msra.mxu1 %v1169_v20  ;;  %1239 = vmatprep.subr.mxu0 %v1165_v21  ;;  %v1213_v20 = vrot.slane %v1200_v18, %v1114_v57  ;;  %v1209_v21 = vrot.slane %v1200_v18, %v1110_v40 }
 0x18f   : > { %1571 = vmatprep.subr.mxu1 %v1706_v4  ;;  %1240 = vmatpush1.msra.mxu0 %v1164_v22 }
 0x190   : > { %1572 = vmatpush3.msra.mxu1 %v1166_v23  ;;  %1241 = vmatprep.subr.mxu0 %v1162_v24 }
 0x191   : > { %1573 = vmatprep.subr.mxu1 %v1706_v4  ;;  %1242 = vmatpush1.msra.mxu0 %v1161_v25 }
 0x192   : > { %1574 = vmatpush3.msra.mxu1 %v1163_v26  ;;  %1243 = vmatprep.subr.mxu0 %v1159_v27 }
 0x193   : > { %1575 = vmatprep.subr.mxu1 %v1706_v4  ;;  %1244 = vmatpush1.msra.mxu0 %v1158_v28 }
 0x194   : > { %1576 = vmatpush3.msra.mxu1 %v1160_v29  ;;  %1245 = vmatprep.subr.mxu0 %v1156_v30 }
 0x195   : > { %1577 = vmatprep.subr.mxu1 %v1706_v4  ;;  %1246 = vmatpush1.msra.mxu0 %v1155_v31 }
 0x196   : > { %1578 = vmatpush3.msra.mxu1 %v1157_v32  ;;  %1247 = vmatprep.subr.mxu0 %v1153_v33 }
 0x197   : > { %1579 = vmatprep.subr.mxu1 %v1706_v4  ;;  %1248 = vmatpush1.msra.mxu0 %v1152_v34 }
 0x198   : > { %1580 = vmatpush3.msra.mxu1 %v1154_v35  ;;  %1581 = vmatprep.mubr.msk.f32.mxu1 %vm1708_vm1, %v1706_v4 }
 0x238   : > { %v1026_v43 = vpop.f32.mrf.mxu0  ;;  %v1097_v49 = vpop.f32.mrf.mxu1 }
 0x239   : > { %v1027_v45 = vadd.f32 %v1026_v43, %v884_v36  ;;  %v1098_v59 = vadd.f32 %v1097_v49, %v955_v39 }
 0x23a   : > { %v1028_v47 = vpop.f32.mrf.mxu0  ;;  %v1099_v54 = vpop.f32.mrf.mxu1 }
 0x23b   : > { %v1124_v48 = vadd.f32 %v1107_v42, %v1027_v45  ;;  %v1029_v4 = vadd.f32 %v1028_v47, %v886_v41  ;;  %v1100_v55 = vadd.f32 %v1099_v54, %v957_v44  ;;  %v1126_v63 = vadd.f32 %v1115_v60, %v1098_v59 }
 0x23d   : > { %v1526_v50 = vmul.f32 -1.442695, %v1124_v48  ;;  %v1125_v51 = vadd.f32 %v1111_v46, %v1029_v4  ;;  %v1127_v58 = vadd.f32 %v1119_v56, %v1100_v55 }
 0x23f   : > { %1631 = vpow2.f32 %v1526_v50  ;;  %v1527_v53 = vmul.f32 -1.442695, %v1125_v51  ;;  %v1528_v61 = vmul.f32 -1.442695, %v1127_v58 }
 0x241   : > { %1633 = vpow2.f32 %v1527_v53 }
 0x242   : > { %1635 = vpow2.f32 %v1528_v61 }
 0x24c   : > { %v1632_v62 = vpop.eup %1631 }
 0x24d   : > { %v1131_v0 = vadd.f32 1.0, %v1632_v62 }
 0x24e   : > { %v1634_v1 = vpop.eup %1633 }
 0x24f   : > { %1637 = vrcp.f32 %v1131_v0  ;;  %v1137_v2 = vadd.f32 1.0, %v1634_v1  ;;  %v1636_v3 = vpop.eup %1635 }
 0x250   : > { %1639 = vtanh.f32 %v1126_v63  ;;  %v1144_v8 = vadd.f32 1.0, %v1636_v3 }
 0x251   : > { %1641 = vrcp.f32 %v1137_v2 }
 0x252   : > { %1643 = vrcp.f32 %v1144_v8 }
 0x25c   : > { %v1638_v5 = vpop.eup %1637 }
 0x25d   : > { %v1640_v12 = vpop.eup %1639 }
 0x25e   : > { %v1642_v7 = vpop.eup %1641  ;;  %v1148_v9 = vmul.f32 %v1640_v12, %v1638_v5 }
 0x25f   : > { %v1147_v11 = vmul.f32 %v1642_v7, %v421_v6  ;;  %v1644_v14 = vpop.eup %1643 }
 0x261   : > { %v1149_v13 = vadd.f32 %v1148_v9, %v1147_v11 }
 0x263   : > { %1380 = vst [vmem:[%s2498_s12] sm:$0x1] %v1149_v13  ;;  %1645 = vtanh.f32 %v1149_v13 }
 0x270   : > { %v1646_v16 = vpop.eup %1645 }
 0x271   : > { %v1151_v17 = vmul.f32 %v1646_v16, %v1644_v14 }
 0x273   : > { %1282 = vmatmul.mubr.f32.vlgmr.msra.gmra.mxu0 %v1151_v17  ;;  %1379 = vst [vmem:[%s2497_s11] sm:$0x1] %v1151_v17  ;;  %1582 = vmatmul.mubr.f32.vlgmr.msra.gmra.mxu1 %v1151_v17 }
 0x333   : > { %v1283_v22 = vpop.f32.mrf.mxu0  ;;  %v1354_v23 = vpop.f32.mrf.mxu1 }
 0x334   : > { %v1284_v24 = vadd.f32 %v1283_v22, %v1205_v19  ;;  %v1355_v27 = vadd.f32 %v1354_v23, %v1213_v20 }
 0x335   : > { %v1285_v25 = vpop.f32.mrf.mxu0  ;;  %v1583_v26 = vpop.f32.mrf.mxu1 }
 0x336   : > { %v1286_v28 = vadd.f32 %v1285_v25, %v1209_v21  ;;  %v1359_v29 = vsel %vm1358_vm2, %v1284_v24, 0.0  ;;  %v1362_v32 = vsel %vm1358_vm2, %v1355_v27, 0.0 }
 0x338   : > { %v1360_v30 = vsel %vm1358_vm2, %v1286_v28, 0.0 }
 0x339   : > { %v1361_v31 = vadd.f32 %v1360_v30, %v1359_v29 }
 0x33b   : > { %v1363_v33 = vadd.f32 %v1362_v32, %v1361_v31 }
 0x33d   : > { %1364 = vadd.xlane.f32.xlu0 %v1363_v33 }
 0x3c6   : > { %v1365_v34 = vpop.xlane.xlu0 %1364 }
 0x3c7   : > { %v1366_v35 = vrot.slane %v1365_v34, 4 }
 0x3c9   : > { %v1367_v36 = vadd.f32 %v1366_v35, %v1365_v34 }
 0x3cb   : > { %v1368_v37 = vrot.slane %v1367_v36, 2 }
 0x3cd   : > { %v1369_v38 = vadd.f32 %v1368_v37, %v1367_v36 }
 0x3cf   : > { %v1370_v39 = vrot.slane %v1369_v38, 1 }
 0x3d1   : > { %v1371_v40 = vadd.f32 %v1370_v39, %v1369_v38 }
 0x3d3   : > { %1585 = vpush %v1371_v40 }
 0x404   : > { %s1586_s18 = spop %1585 }
 0x405   : > { %p1373_p10 = scmp.eq.f32.partialorder %s1586_s18, 0.0 }
 0x407   : > { %p1376_p11 = por %p1375_p9, %p1373_p10 }
 0x409   : > { %s1381_s19 = scalar_select %p1376_p11, 1, 0 }
 0x40a   : > { %s1529_s20 = scalar_select %p1376_p11, 0, 1 }
 0x40b   : > { %v1382_v41 = vstv %s1381_s19 }
 0x40c   : > { %vm1383_vm3 = vcmp.eq.s32.totalorder %v1382_v41, 1  ;;  %1422 = sst [smem:[#allocation2]] %s1529_s20 }
 0x40d   : > { %v1384_v42 = vsel %vm1383_vm3, 0.0, %v1284_v24  ;;  %v1385_v43 = vsel %vm1383_vm3, 0.0, %v1286_v28  ;;  %v1386_v44 = vsel %vm1383_vm3, 0.0, %v1355_v27 }
 0x40e   : > { %v1390_v45 = vcombine.low %v1384_v42, %v1385_v43  ;;  %v1404_v47 = vrot.slane %v1386_v44, %v2426_v15 }
 0x410   : > { %v1397_v46 = vrot.slane %v1390_v45, %v2426_v15 }
 0x412   : > { %v1405_v48 = vcombine.low %v1397_v46, %v1404_v47 }
 0x414   : > { %v1412_v49 = vrot.slane %v1405_v48, %v2426_v15 }
 0x416   : > { %1418 = vst.msk [vmem:[%s1816_s25] sm:$0x7] %vm1416_vm4, %v1412_v49 }
 0x417 PF: > { %s30_s26 = sadd.s32 1, %s1697_s26  }
 0x418   : > { %p27_p12 = scmp.ge.s32.totalorder %s30_s26, 10  }
 0x41a   :  { %29 = sbr.rel (!%p27_p12) target bundleno = 16 (0x10), region = 129 }
 0x41f   :  { %1466 = vsyncpa [#allocation6], 1 }
 0x420   :  { %1468 = vsyncpa [#allocation6 + $0x1], 1 }

</bundles_post_ra>
